<compile_context>
chip_gen: v7x
topology: tpu7x:2x2x1
jax: 0.10.0
libtpu: 0.0.40
codegen_flags: <defaults>
</compile_context>

<pallas_src>
import functools

import jax
import jax.numpy as jnp
from jax.experimental import pallas as pl
from jax.experimental.pallas import tpu as pltpu

# Module-consistent hyperparameters (small demo sizes).
HEAD_NUM = 4
HEAD_DIM = 8
D_MODEL = HEAD_NUM * HEAD_DIM        # 32  (= head_num * head_dim)
ATT_HID = 16                         # hparams.attention_hidden_dim
SEQ = 8                              # clicked-news history length
BATCH = 16                           # demo batch
BT = 8                               # users per grid step (multiple of 8)


def _user_encoder_kernel(x_ref, wqkv_ref, bqkv_ref, watt_ref, batt_ref,
                         qatt_ref, out_ref, *, bt, seq):
    d = D_MODEL
    hd = HEAD_DIM
    hn = HEAD_NUM
    scale = 1.0 / float(hd) ** 0.5

    x = x_ref[...]                                              # (bt*seq, d)

    # ---- fused Q/K/V projection: one MXU matmul (bt*seq, d) x (d, 3d) ----
    qkv = jnp.dot(x, wqkv_ref[...],
                  preferred_element_type=jnp.float32) + bqkv_ref[...]
    q = qkv[:, :d] * scale
    k = qkv[:, d:2 * d]
    v = qkv[:, 2 * d:]

    # ---- multi-head self-attention, heads stacked on the major axis ----
    # (hn*bt, seq, hd): head h occupies rows [h*bt, (h+1)*bt).  One batched
    # score matmul + one batched PV matmul replace a per-head loop.
    def split_heads(t):
        t3 = t.reshape(bt, seq, d)
        return jnp.concatenate(
            [t3[:, :, h * hd:(h + 1) * hd] for h in range(hn)], axis=0)

    qh = split_heads(q)
    kh = split_heads(k)
    vh = split_heads(v)

    s = jnp.einsum('bqd,bkd->bqk', qh, kh,
                   preferred_element_type=jnp.float32)          # (hn*bt, seq, seq)
    s = s - jnp.max(s, axis=-1, keepdims=True)
    p = jnp.exp(s)
    p = p * pl.reciprocal(jnp.sum(p, axis=-1, keepdims=True), approx=True)
    oh = jnp.einsum('bqk,bkd->bqd', p, vh,
                    preferred_element_type=jnp.float32)         # (hn*bt, seq, hd)

    # re-assemble heads along the feature axis -> (bt, seq, d)
    o = jnp.concatenate([oh[h * bt:(h + 1) * bt] for h in range(hn)], axis=-1)

    # ---- additive attention pooling (AttLayer) ----
    e = jnp.tanh(jnp.dot(o.reshape(bt * seq, d), watt_ref[...],
                         preferred_element_type=jnp.float32) + batt_ref[...])
    # qatt passed as (1, A): VPU broadcast-multiply + lane reduce instead of an
    # N=1 MXU matmul.
    a = jnp.sum(e.reshape(bt, seq, ATT_HID) * qatt_ref[...], axis=-1)  # (bt, seq)
    a = a - jnp.max(a, axis=-1, keepdims=True)
    a = jnp.exp(a)
    a = a * pl.reciprocal(jnp.sum(a, axis=-1, keepdims=True), approx=True)

    out_ref[...] = jnp.sum(o * a[:, :, None], axis=1)           # (bt, d)


def user_encoder(x, params, *, bt=BT):
    """x: (B, S, D) float32 -> (B, D) float32 user representation."""
    B, S, D = x.shape
    assert D == D_MODEL
    assert bt % 8 == 0, "batch tile must be a multiple of the 8-row sublane tile"
    wq, bq, wk, bk, wv, bv, watt, batt, qatt = params

    # Fuse the three projection weights/biases once (tiny trace-time constants).
    wqkv = jnp.concatenate([wq, wk, wv], axis=1)                # (D, 3D)
    bqkv = jnp.concatenate([bq, bk, bv], axis=1)                # (1, 3D)
    qatt_row = qatt.reshape(1, ATT_HID)                         # (1, A)

    # Pad the batch to a multiple of the tile and flatten to (B*S, D).
    bp = ((B + bt - 1) // bt) * bt
    xp = jnp.pad(x, ((0, bp - B), (0, 0), (0, 0))) if bp != B else x
    x2 = xp.reshape(bp * S, D)

    kernel = functools.partial(_user_encoder_kernel, bt=bt, seq=S)
    out = pl.pallas_call(
        kernel,
        out_shape=jax.ShapeDtypeStruct((bp, D), jnp.float32),
        grid=(bp // bt,),
        in_specs=[
            pl.BlockSpec((bt * S, D), lambda i: (i, 0)),        # per-step user slab
            pl.BlockSpec(wqkv.shape, lambda i: (0, 0)),         # weights stay resident
            pl.BlockSpec(bqkv.shape, lambda i: (0, 0)),
            pl.BlockSpec(watt.shape, lambda i: (0, 0)),
            pl.BlockSpec(batt.shape, lambda i: (0, 0)),
            pl.BlockSpec(qatt_row.shape, lambda i: (0, 0)),
        ],
        out_specs=pl.BlockSpec((bt, D), lambda i: (i, 0)),
        compiler_params=pltpu.CompilerParams(
            dimension_semantics=("parallel",)),
    )(x2, wqkv, bqkv, watt, batt, qatt_row)
    return out[:B]


def make_params(key):
    ks = jax.random.split(key, 9)
    scale = 0.1
    wq = scale * jax.random.normal(ks[0], (D_MODEL, D_MODEL), jnp.float32)
    bq = scale * jax.random.normal(ks[1], (1, D_MODEL), jnp.float32)
    wk = scale * jax.random.normal(ks[2], (D_MODEL, D_MODEL), jnp.float32)
    bk = scale * jax.random.normal(ks[3], (1, D_MODEL), jnp.float32)
    wv = scale * jax.random.normal(ks[4], (D_MODEL, D_MODEL), jnp.float32)
    bv = scale * jax.random.normal(ks[5], (1, D_MODEL), jnp.float32)
    watt = scale * jax.random.normal(ks[6], (D_MODEL, ATT_HID), jnp.float32)
    batt = scale * jax.random.normal(ks[7], (1, ATT_HID), jnp.float32)
    qatt = scale * jax.random.normal(ks[8], (ATT_HID, 1), jnp.float32)
    return (wq, bq, wk, bk, wv, bv, watt, batt, qatt)


def user_encoder_ref(x, params):
    """Pure-JAX reference of the same forward pass."""
    wq, bq, wk, bk, wv, bv, watt, batt, qatt = params
    q = x @ wq + bq
    k = x @ wk + bk
    v = x @ wv + bv
    B, S, _ = x.shape
    qh = q.reshape(B, S, HEAD_NUM, HEAD_DIM).transpose(0, 2, 1, 3)
    kh = k.reshape(B, S, HEAD_NUM, HEAD_DIM).transpose(0, 2, 1, 3)
    vh = v.reshape(B, S, HEAD_NUM, HEAD_DIM).transpose(0, 2, 1, 3)
    scores = jnp.einsum("bhqd,bhkd->bhqk", qh, kh) / jnp.sqrt(jnp.float32(HEAD_DIM))
    p = jax.nn.softmax(scores, axis=-1)
    oh = jnp.einsum("bhqk,bhkd->bhqd", p, vh)
    o = oh.transpose(0, 2, 1, 3).reshape(B, S, D_MODEL)
    e = jnp.tanh(o @ watt + batt)
    a = jax.nn.softmax((e @ qatt)[..., 0], axis=-1)             # (B, S)
    return jnp.einsum("bs,bsd->bd", a, o)


if __name__ == "__main__":
    key = jax.random.PRNGKey(0)
    kx, kp = jax.random.split(key)
    x = jax.random.normal(kx, (BATCH, SEQ, D_MODEL), jnp.float32)
    params = make_params(kp)

    out = jax.block_until_ready(user_encoder(x, params))
    ref = user_encoder_ref(x, params)

    assert out.shape == (BATCH, D_MODEL)
    # Tolerance relaxed slightly vs. exact division because the softmax
    # denominators use the EUP approximate reciprocal.
    assert jnp.allclose(out, ref, atol=2e-3, rtol=2e-3), (
        f"max abs err {jnp.max(jnp.abs(out - ref))}")
    print("KERNEL_OK")
</pallas_src>

<mosaic_0001>
module attributes {stable_mosaic.version = 11 : i64} {
  func.func @_user_encoder_kernel(%arg0: i32, %arg1: memref<64x32xf32, #tpu.memory_space<vmem>>, %arg2: memref<32x96xf32, #tpu.memory_space<vmem>>, %arg3: memref<1x96xf32, #tpu.memory_space<vmem>>, %arg4: memref<32x16xf32, #tpu.memory_space<vmem>>, %arg5: memref<1x16xf32, #tpu.memory_space<vmem>>, %arg6: memref<1x16xf32, #tpu.memory_space<vmem>>, %arg7: memref<8x32xf32, #tpu.memory_space<vmem>>) attributes {dimension_semantics = [#tpu.dimension_semantics<parallel>], iteration_bounds = array<i64: 2>, scalar_prefetch = 0 : i64, scratch_operands = 0 : i64, tpu.core_type = #tpu.core_type<tc>, window_params = [{transform_indices = @transform_0, window_bounds = array<i64: 64, 32>}, {pipeline_mode = #tpu.pipeline_mode<synchronous>, transform_indices = @transform_1, window_bounds = array<i64: 32, 96>}, {pipeline_mode = #tpu.pipeline_mode<synchronous>, transform_indices = @transform_2, window_bounds = array<i64: 1, 96>}, {pipeline_mode = #tpu.pipeline_mode<synchronous>, transform_indices = @transform_3, window_bounds = array<i64: 32, 16>}, {pipeline_mode = #tpu.pipeline_mode<synchronous>, transform_indices = @transform_4, window_bounds = array<i64: 1, 16>}, {pipeline_mode = #tpu.pipeline_mode<synchronous>, transform_indices = @transform_5, window_bounds = array<i64: 1, 16>}, {transform_indices = @transform_6, window_bounds = array<i64: 8, 32>}]} {
    %c0 = arith.constant 0 : index
    %c0_0 = arith.constant 0 : index
    %0 = vector.load %arg1[%c0, %c0_0] : memref<64x32xf32, #tpu.memory_space<vmem>>, vector<64x32xf32>
    %c0_1 = arith.constant 0 : index
    %c0_2 = arith.constant 0 : index
    %1 = vector.load %arg2[%c0_1, %c0_2] : memref<32x96xf32, #tpu.memory_space<vmem>>, vector<32x96xf32>
    %cst = arith.constant dense<0.000000e+00> : vector<64x96xf32>
    %2 = tpu.matmul %0, %1, %cst {dimension_numbers = #tpu.dot_dimension_numbers<[1], [0], [0], [1], [0, 0, 1, 1], [], []>} : vector<64x32xf32>, vector<32x96xf32>, vector<64x96xf32> -> vector<64x96xf32>
    %c0_3 = arith.constant 0 : index
    %c0_4 = arith.constant 0 : index
    %3 = vector.load %arg3[%c0_3, %c0_4] : memref<1x96xf32, #tpu.memory_space<vmem>>, vector<1x96xf32>
    %4 = vector.broadcast %3 : vector<1x96xf32> to vector<64x96xf32>
    %5 = arith.addf %2, %4 : vector<64x96xf32>
    %6 = vector.extract_strided_slice %5 {offsets = [0, 0], sizes = [64, 32], strides = [1, 1]} : vector<64x96xf32> to vector<64x32xf32>
    %cst_5 = arith.constant 0.353553385 : f32
    %7 = vector.broadcast %cst_5 : f32 to vector<64x32xf32>
    %8 = arith.mulf %6, %7 : vector<64x32xf32>
    %9 = vector.extract_strided_slice %5 {offsets = [0, 32], sizes = [64, 32], strides = [1, 1]} : vector<64x96xf32> to vector<64x32xf32>
    %10 = vector.extract_strided_slice %5 {offsets = [0, 64], sizes = [64, 32], strides = [1, 1]} : vector<64x96xf32> to vector<64x32xf32>
    %11 = vector.shape_cast %8 : vector<64x32xf32> to vector<8x8x32xf32>
    %12 = vector.extract_strided_slice %11 {offsets = [0, 0, 0], sizes = [8, 8, 8], strides = [1, 1, 1]} : vector<8x8x32xf32> to vector<8x8x8xf32>
    %13 = vector.extract_strided_slice %11 {offsets = [0, 0, 8], sizes = [8, 8, 8], strides = [1, 1, 1]} : vector<8x8x32xf32> to vector<8x8x8xf32>
    %14 = vector.extract_strided_slice %11 {offsets = [0, 0, 16], sizes = [8, 8, 8], strides = [1, 1, 1]} : vector<8x8x32xf32> to vector<8x8x8xf32>
    %15 = vector.extract_strided_slice %11 {offsets = [0, 0, 24], sizes = [8, 8, 8], strides = [1, 1, 1]} : vector<8x8x32xf32> to vector<8x8x8xf32>
    %16 = tpu.concatenate %12, %13, %14, %15 in 0 : vector<8x8x8xf32>, vector<8x8x8xf32>, vector<8x8x8xf32>, vector<8x8x8xf32> -> vector<32x8x8xf32>
    %17 = vector.shape_cast %9 : vector<64x32xf32> to vector<8x8x32xf32>
    %18 = vector.extract_strided_slice %17 {offsets = [0, 0, 0], sizes = [8, 8, 8], strides = [1, 1, 1]} : vector<8x8x32xf32> to vector<8x8x8xf32>
    %19 = vector.extract_strided_slice %17 {offsets = [0, 0, 8], sizes = [8, 8, 8], strides = [1, 1, 1]} : vector<8x8x32xf32> to vector<8x8x8xf32>
    %20 = vector.extract_strided_slice %17 {offsets = [0, 0, 16], sizes = [8, 8, 8], strides = [1, 1, 1]} : vector<8x8x32xf32> to vector<8x8x8xf32>
    %21 = vector.extract_strided_slice %17 {offsets = [0, 0, 24], sizes = [8, 8, 8], strides = [1, 1, 1]} : vector<8x8x32xf32> to vector<8x8x8xf32>
    %22 = tpu.concatenate %18, %19, %20, %21 in 0 : vector<8x8x8xf32>, vector<8x8x8xf32>, vector<8x8x8xf32>, vector<8x8x8xf32> -> vector<32x8x8xf32>
    %23 = vector.shape_cast %10 : vector<64x32xf32> to vector<8x8x32xf32>
    %24 = vector.extract_strided_slice %23 {offsets = [0, 0, 0], sizes = [8, 8, 8], strides = [1, 1, 1]} : vector<8x8x32xf32> to vector<8x8x8xf32>
    %25 = vector.extract_strided_slice %23 {offsets = [0, 0, 8], sizes = [8, 8, 8], strides = [1, 1, 1]} : vector<8x8x32xf32> to vector<8x8x8xf32>
    %26 = vector.extract_strided_slice %23 {offsets = [0, 0, 16], sizes = [8, 8, 8], strides = [1, 1, 1]} : vector<8x8x32xf32> to vector<8x8x8xf32>
    %27 = vector.extract_strided_slice %23 {offsets = [0, 0, 24], sizes = [8, 8, 8], strides = [1, 1, 1]} : vector<8x8x32xf32> to vector<8x8x8xf32>
    %28 = tpu.concatenate %24, %25, %26, %27 in 0 : vector<8x8x8xf32>, vector<8x8x8xf32>, vector<8x8x8xf32>, vector<8x8x8xf32> -> vector<32x8x8xf32>
    "tpu.trace_start"() <{level = 10 : i32, message = "bqd,bkd->bqk"}> : () -> ()
    %cst_6 = arith.constant dense<0.000000e+00> : vector<32x8x8xf32>
    %29 = tpu.matmul %16, %22, %cst_6 {dimension_numbers = #tpu.dot_dimension_numbers<[2], [2], [1], [1], [0, 0, 0, 1, 1, 1], [0], [0]>} : vector<32x8x8xf32>, vector<32x8x8xf32>, vector<32x8x8xf32> -> vector<32x8x8xf32>
    "tpu.trace_stop"() : () -> ()
    %cst_7 = arith.constant dense<0xFF800000> : vector<32x8xf32>
    %30 = vector.multi_reduction <maximumf>, %29, %cst_7 [2] : vector<32x8x8xf32> to vector<32x8xf32>
    %31 = vector.shape_cast %30 : vector<32x8xf32> to vector<32x8x1xf32>
    %32 = vector.broadcast %31 : vector<32x8x1xf32> to vector<32x8x8xf32>
    %33 = arith.subf %29, %32 : vector<32x8x8xf32>
    %34 = math.exp %33 : vector<32x8x8xf32>
    %cst_8 = arith.constant dense<0.000000e+00> : vector<32x8xf32>
    %35 = vector.multi_reduction <add>, %34, %cst_8 [2] : vector<32x8x8xf32> to vector<32x8xf32>
    %36 = vector.shape_cast %35 : vector<32x8xf32> to vector<32x8x1xf32>
    %37 = tpu.reciprocal %36 {approx = true} : vector<32x8x1xf32> -> vector<32x8x1xf32>
    %38 = vector.broadcast %37 : vector<32x8x1xf32> to vector<32x8x8xf32>
    %39 = arith.mulf %34, %38 : vector<32x8x8xf32>
    "tpu.trace_start"() <{level = 10 : i32, message = "bqk,bkd->bqd"}> : () -> ()
    %cst_9 = arith.constant dense<0.000000e+00> : vector<32x8x8xf32>
    %40 = tpu.matmul %39, %28, %cst_9 {dimension_numbers = #tpu.dot_dimension_numbers<[2], [1], [1], [2], [0, 0, 0, 1, 1, 2], [0], [0]>} : vector<32x8x8xf32>, vector<32x8x8xf32>, vector<32x8x8xf32> -> vector<32x8x8xf32>
    "tpu.trace_stop"() : () -> ()
    %41 = vector.extract_strided_slice %40 {offsets = [0, 0, 0], sizes = [8, 8, 8], strides = [1, 1, 1]} : vector<32x8x8xf32> to vector<8x8x8xf32>
    %42 = vector.extract_strided_slice %40 {offsets = [8, 0, 0], sizes = [8, 8, 8], strides = [1, 1, 1]} : vector<32x8x8xf32> to vector<8x8x8xf32>
    %43 = vector.extract_strided_slice %40 {offsets = [16, 0, 0], sizes = [8, 8, 8], strides = [1, 1, 1]} : vector<32x8x8xf32> to vector<8x8x8xf32>
    %44 = vector.extract_strided_slice %40 {offsets = [24, 0, 0], sizes = [8, 8, 8], strides = [1, 1, 1]} : vector<32x8x8xf32> to vector<8x8x8xf32>
    %45 = tpu.concatenate %41, %42, %43, %44 in 2 : vector<8x8x8xf32>, vector<8x8x8xf32>, vector<8x8x8xf32>, vector<8x8x8xf32> -> vector<8x8x32xf32>
    %46 = vector.shape_cast %45 : vector<8x8x32xf32> to vector<64x32xf32>
    %c0_10 = arith.constant 0 : index
    %c0_11 = arith.constant 0 : index
    %47 = vector.load %arg4[%c0_10, %c0_11] : memref<32x16xf32, #tpu.memory_space<vmem>>, vector<32x16xf32>
    %cst_12 = arith.constant dense<0.000000e+00> : vector<64x16xf32>
    %48 = tpu.matmul %46, %47, %cst_12 {dimension_numbers = #tpu.dot_dimension_numbers<[1], [0], [0], [1], [0, 0, 1, 1], [], []>} : vector<64x32xf32>, vector<32x16xf32>, vector<64x16xf32> -> vector<64x16xf32>
    %c0_13 = arith.constant 0 : index
    %c0_14 = arith.constant 0 : index
    %49 = vector.load %arg5[%c0_13, %c0_14] : memref<1x16xf32, #tpu.memory_space<vmem>>, vector<1x16xf32>
    %50 = vector.broadcast %49 : vector<1x16xf32> to vector<64x16xf32>
    %51 = arith.addf %48, %50 : vector<64x16xf32>
    %52 = math.tanh %51 : vector<64x16xf32>
    %53 = vector.shape_cast %52 : vector<64x16xf32> to vector<8x8x16xf32>
    %c0_15 = arith.constant 0 : index
    %c0_16 = arith.constant 0 : index
    %54 = vector.load %arg6[%c0_15, %c0_16] : memref<1x16xf32, #tpu.memory_space<vmem>>, vector<1x16xf32>
    %55 = vector.shape_cast %54 : vector<1x16xf32> to vector<1x1x16xf32>
    %56 = vector.broadcast %55 : vector<1x1x16xf32> to vector<8x8x16xf32>
    %57 = arith.mulf %53, %56 : vector<8x8x16xf32>
    %cst_17 = arith.constant dense<0.000000e+00> : vector<8x8xf32>
    %58 = vector.multi_reduction <add>, %57, %cst_17 [2] : vector<8x8x16xf32> to vector<8x8xf32>
    %cst_18 = arith.constant dense<0xFF800000> : vector<8xf32>
    %59 = vector.multi_reduction <maximumf>, %58, %cst_18 [1] : vector<8x8xf32> to vector<8xf32>
    %60 = vector.shape_cast %59 : vector<8xf32> to vector<8x1xf32>
    %61 = vector.broadcast %60 : vector<8x1xf32> to vector<8x8xf32>
    %62 = arith.subf %58, %61 : vector<8x8xf32>
    %63 = math.exp %62 : vector<8x8xf32>
    %cst_19 = arith.constant dense<0.000000e+00> : vector<8xf32>
    %64 = vector.multi_reduction <add>, %63, %cst_19 [1] : vector<8x8xf32> to vector<8xf32>
    %65 = vector.shape_cast %64 : vector<8xf32> to vector<8x1xf32>
    %66 = tpu.reciprocal %65 {approx = true} : vector<8x1xf32> -> vector<8x1xf32>
    %67 = vector.broadcast %66 : vector<8x1xf32> to vector<8x8xf32>
    %68 = arith.mulf %63, %67 : vector<8x8xf32>
    %69 = vector.shape_cast %68 : vector<8x8xf32> to vector<8x8x1xf32>
    %70 = vector.broadcast %69 : vector<8x8x1xf32> to vector<8x8x32xf32>
    %71 = arith.mulf %45, %70 : vector<8x8x32xf32>
    %cst_20 = arith.constant dense<0.000000e+00> : vector<8x32xf32>
    %72 = vector.multi_reduction <add>, %71, %cst_20 [1] : vector<8x8x32xf32> to vector<8x32xf32>
    %c0_21 = arith.constant 0 : index
    %c0_22 = arith.constant 0 : index
    %73 = vector.load %arg7[%c0_21, %c0_22] : memref<8x32xf32, #tpu.memory_space<vmem>>, vector<8x32xf32>
    tpu.vector_store %arg7[%c0_21, %c0_22], %72 {strides = array<i32>} : memref<8x32xf32, #tpu.memory_space<vmem>>, vector<8x32xf32>,
    return
  }
  func.func @transform_0(%arg0: i32) -> (i32, i32) {
    %c0_i32 = arith.constant 0 : i32
    %c0_i32_0 = arith.constant 0 : i32
    return %arg0, %c0_i32 : i32, i32
  }
  func.func @transform_1(%arg0: i32) -> (i32, i32) {
    %c0_i32 = arith.constant 0 : i32
    %c0_i32_0 = arith.constant 0 : i32
    %c0_i32_1 = arith.constant 0 : i32
    return %c0_i32, %c0_i32_0 : i32, i32
  }
  func.func @transform_2(%arg0: i32) -> (i32, i32) {
    %c0_i32 = arith.constant 0 : i32
    %c0_i32_0 = arith.constant 0 : i32
    %c0_i32_1 = arith.constant 0 : i32
    return %c0_i32, %c0_i32_0 : i32, i32
  }
  func.func @transform_3(%arg0: i32) -> (i32, i32) {
    %c0_i32 = arith.constant 0 : i32
    %c0_i32_0 = arith.constant 0 : i32
    %c0_i32_1 = arith.constant 0 : i32
    return %c0_i32, %c0_i32_0 : i32, i32
  }
  func.func @transform_4(%arg0: i32) -> (i32, i32) {
    %c0_i32 = arith.constant 0 : i32
    %c0_i32_0 = arith.constant 0 : i32
    %c0_i32_1 = arith.constant 0 : i32
    return %c0_i32, %c0_i32_0 : i32, i32
  }
  func.func @transform_5(%arg0: i32) -> (i32, i32) {
    %c0_i32 = arith.constant 0 : i32
    %c0_i32_0 = arith.constant 0 : i32
    %c0_i32_1 = arith.constant 0 : i32
    return %c0_i32, %c0_i32_0 : i32, i32
  }
  func.func @transform_6(%arg0: i32) -> (i32, i32) {
    %c0_i32 = arith.constant 0 : i32
    %c0_i32_0 = arith.constant 0 : i32
    return %arg0, %c0_i32 : i32, i32
  }
}

</mosaic_0001>

<bundles_post_ra>
// kernel: tpu_custom_call.1
= control target key start
LH: loop header
LB: loop body
LE: loop exit
PB: predicated region body
PF: predicated region fallthrough
CT: control target
= control target key end

     0   :  { %11 = vsyncpa [#allocation3], 0  ;;  %s8871_s0 = inlined_call_operand.vmem [shape: f32[128,32], index: 0, kind: input, shape index: {}]   ;;  %s8872_s1 = inlined_call_operand.vmem [shape: f32[32,96], index: 1, kind: input, shape index: {}]   ;;  %s8873_s2 = inlined_call_operand.vmem [shape: f32[1,96], index: 2, kind: input, shape index: {}]   ;;  %s8874_s3 = inlined_call_operand.vmem [shape: f32[32,16], index: 3, kind: input, shape index: {}]   ;;  %s8875_s4 = inlined_call_operand.vmem [shape: f32[1,16], index: 4, kind: input, shape index: {}]   ;;  %s8876_s5 = inlined_call_operand.vmem [shape: f32[1,16], index: 5, kind: input, shape index: {}]   ;;  %s8877_s6 = inlined_call_operand.hbm [shape: f32[16,32], index: 6, kind: output, shape index: {}]  }
   0x1   :  { %13 = vsyncpa [#allocation3 + $0x1], 0  ;;  %s7470_s21 = smov 0   ;;  %s7472_s22 = smov 0  }
   0x2   :  { %s7474_s23 = smov 0   ;;  %s7476_s24 = smov 0  }
   0x3 LB: > { %s7491_s25 = sadd.s32 4294967295, %s7421_s24   ;;  %s6491_s26 = sadd.s32 4294967294, %s7421_s24   ;;  %s7421_s24 = sphi %s7476_s24, %s8908_s24   ;;  %s7417_s23 = sphi %s7474_s23, %s8907_s23   ;;  %s7413_s22 = sphi %s7472_s22, %s8906_s22   ;;  %s7409_s21 = sphi %s7470_s21, %s8905_s21  }
   0x4   : > { %s7495_s27 = sadd.s32 1, %s7421_s24   ;;  %s157_s28 = sadd.s32 1, %s7417_s23 }
   0x5   : > { %s154_s29 = ssub.s32 %s7421_s24, %s7495_s27  ;;  %p167_p0 = scmp.ne.s32.totalorder %s7417_s23, %s7413_s22 }
   0x6   : > { %p155_p1 = scmp.eq.s32.totalorder %s154_s29, 0  ;;  %p168_p2 = scmp.eq.s32.totalorder %s7491_s25, 1 }
   0x7   : > { %p173_p3 = scmp.ne.s32.totalorder %s7413_s22, %s7409_s21  ;;  %p174_p4 = scmp.eq.s32.totalorder %s6491_s26, 1 }
   0x8   : > { %s7506_s30 = scalar_select %p155_p1, %s7417_s23, %s157_s28  }
   0x9   : > { %p7508_p5 = por %p168_p2, %p167_p0  ;;  %p7512_p6 = por %p174_p4, %p173_p3 }
   0xa   : > { %p6494_p7 = scmp.ge.s32.totalorder %s7421_s24, 1  ;;  %p216_p8 = scmp.lt.s32.totalorder %s7421_s24, 3 }
   0xc   : > { %p217_p9 = pnand %p6494_p7, %p216_p8 }
   0xe   : > { %220 = sbr.rel (%p217_p9) target bundleno = 2466 (0x9a2), region = 44 }
  0x15   : > { %v260_v0 = vld [vmem:[%s8872_s1] sm:$0xff]  ;;  %v261_v1 = vld [vmem:[%s8872_s1 + $0x8] sm:$0xff]  ;;  %v262_v2 = vld [vmem:[%s8872_s1 + $0x10] sm:$0xff]  ;;  %s6496_s15 = sshll.u32 %s7491_s25, 3  ;;  %vm271_vm0 = vcmask 261120   ;;  %s7423_s9 = smov 112  }
  0x16   : > { %v7129_v3 = vpack.c.bf16 %v261_v1, %v260_v0  ;;  %v263_v4 = vld [vmem:[%s8872_s1 + $0x18] sm:$0xff]  ;;  %p247_p10 = scmp.lt.s32.totalorder %s6496_s15, 15  ;;  %v6498_v14 = vld [vmem:[%s8873_s2] ss:$0 sm:$0xff]  ;;  %s7424_s10 = smov 120   ;;  %v8878_v21 = vmov 0.0  }
  0x17   : > { %v7133_v5 = vpack.c.bf16 %v263_v4, %v262_v2  ;;  %s7425_s11 = smov 104   ;;  %s7426_s12 = smov 96   ;;  %6799 = vmatprep.subr.mxu1 %v8878_v21  ;;  %vm7428_vm1 = vmmov 0   ;;  %vm523_vm2 = vcmask 64512   ;;  %vm5842_vm3 = vcmask 130048  }
  0x18   : > { %7130 = vmatprep.subr.bf16.mxu0 %v7129_v3  ;;  %s8910_s15 = smov (!%p247_p10, %s6496_s15), 15  ;;  %6801 = vmatprep.mubr.msk.f32.mxu1 %vm7428_vm1, %v8878_v21  ;;  %s7429_s13 = smov 64   ;;  %vm5851_vm4 = vcmask 195584   ;;  %vm6089_vm5 = vcmask 1041409   ;;  %vm6091_vm6 = vcmask 1042434   ;;  %vm6093_vm7 = vcmask 1043459  }
  0x19   : > { %7132 = vmatpush3.bf16.msra.mxu0 %v7129_v3  ;;  %s6497_s18 = sshll.u32 %s8910_s15, 3  ;;  %s7430_s14 = smov 8   ;;  %vm6095_vm8 = vcmask 1044484   ;;  %vm6097_vm9 = vcmask 1045509   ;;  %vm6099_vm10 = vcmask 1046534   ;;  %vm6101_vm11 = vcmask 1047559  }
  0x1a   : > { %7134 = vmatprep.subr.bf16.mxu0 %v7133_v5  ;;  %s250_s26 = scalar_lea.vmem %s8871_s0, %s6497_s18  ;;  %s7431_s19 = smov 16  }
  0x1b   : > { %v252_v6 = vld [vmem:[%s250_s26] sm:$0xff]  ;;  %v253_v7 = vld [vmem:[%s250_s26 + $0x8] sm:$0xff]  ;;  %v254_v8 = vld [vmem:[%s250_s26 + $0x10] sm:$0xff]  ;;  %s6614_s16 = sshll.u32 %s7491_s25, 7  ;;  %s7434_s29 = smov [#allocation2]  }
  0x1c   : > { %6777 = vmatprep.mubr.msk.f32.mxu0 %vm271_vm0, %v252_v6  ;;  %v255_v9 = vld [vmem:[%s250_s26 + $0x18] sm:$0xff]  ;;  %v256_v10 = vld [vmem:[%s250_s26 + $0x20] sm:$0xff]  ;;  %v257_v11 = vld [vmem:[%s250_s26 + $0x28] sm:$0xff] }
  0x1d   : > { %7136 = vmatpush3.bf16.msra.mxu0 %v7133_v5  ;;  %v258_v12 = vld [vmem:[%s250_s26 + $0x30] sm:$0xff]  ;;  %v259_v13 = vld [vmem:[%s250_s26 + $0x38] sm:$0xff]  ;;  %s8825_s26 = scalar_lea.hbm %s8877_s6, %s6614_s16 }
  0x1e   : > { %6789 = vmatprep.subr.mxu0 %v8878_v21 }
  0x20   : > { %6778 = vmatmul.mubr.msk.f32.vlgmr.msra.gmra.mrb[0].mxu0 %vm271_vm0, %v253_v7 }
  0x21   : > { %6780 = vmatprep.mubr.msk.f32.mxu0 %vm271_vm0, %v254_v8 }
  0x24   : > { %6781 = vmatmul.mubr.msk.f32.gmra.mrb[2].mxu0 %vm271_vm0, %v255_v9 }
  0x25   : > { %6783 = vmatprep.mubr.msk.f32.mxu0 %vm271_vm0, %v256_v10 }
  0x28   : > { %6784 = vmatmul.mubr.msk.f32.gmra.mrb[4].mxu0 %vm271_vm0, %v257_v11 }
  0x29   : > { %6786 = vmatprep.mubr.msk.f32.mxu0 %vm271_vm0, %v258_v12 }
  0x2c   : > { %6787 = vmatmul.mubr.msk.f32.gmra.mrb[6].mxu0 %vm271_vm0, %v259_v13 }
  0x2d   : > { %6791 = vmatprep.mubr.msk.f32.mxu0 %vm7428_vm1, %v8878_v21 }
  0xf3   : > { %v6779_v15 = vpop.f32.mrb[0].mxu0 }
  0xf4   : > { %v7545_v16 = vadd.f32 %v6779_v15, %v6498_v14  ;;  %v362_v17 = vpop.f32.mrb[1].mxu0 }
  0xf5   : > { %v7557_v22 = vadd.f32 %v6498_v14, %v362_v17 }
  0xf6   : > { %491 = vrot.lane.b32.xlu1 %v7545_v16, %s7423_s9  ;;  %475 = vrot.lane.b32.xlu0 %v7545_v16, %s7424_s10  ;;  %v7560_v23 = vmul.f32 0.35355338, %v7545_v16 }
  0xf7   : > { %v6782_v18 = vpop.f32.mrb[2].mxu0  ;;  %v7585_v28 = vmul.f32 0.35355338, %v7557_v22 }
  0xf8   : > { %v372_v19 = vpop.f32.mrb[3].mxu0  ;;  %v7566_v25 = vadd.f32 %v6782_v18, %v6498_v14 }
  0xf9   : > { %v7591_v29 = vadd.f32 %v6498_v14, %v372_v19 }
  0xfa   : > { %507 = vrot.lane.b32.xlu1 %v7545_v16, %s7425_s11  ;;  %598 = vrot.lane.b32.xlu0 %v7545_v16, %s7426_s12  ;;  %v7602_v30 = vmul.f32 0.35355338, %v7566_v25 }
  0xfb   : > { %v6785_v20 = vpop.f32.mrb[4].mxu0  ;;  %v7605_v31 = vmul.f32 0.35355338, %v7591_v29 }
  0xfc   : > { %v382_v24 = vpop.f32.mrb[5].mxu0  ;;  %v7607_v32 = vadd.f32 %v6785_v20, %v6498_v14 }
  0xfd   : > { %v7617_v33 = vadd.f32 %v6498_v14, %v382_v24 }
  0xfe   : > { %419 = vrot.lane.b32.xlu1 %v7560_v23, %s7424_s10  ;;  %473 = vrot.lane.b32.xlu0 %v7557_v22, %s7424_s10  ;;  %v7651_v37 = vmul.f32 0.35355338, %v7607_v32 }
  0xff   : > { %v6788_v26 = vpop.f32.mrb[6].mxu0  ;;  %v7644_v36 = vmul.f32 0.35355338, %v7617_v33 }
 0x100   : > { %v392_v27 = vpop.f32.mrb[7].mxu0  ;;  %v7627_v34 = vadd.f32 %v6788_v26, %v6498_v14 }
 0x101   : > { %v7637_v35 = vadd.f32 %v6498_v14, %v392_v27 }
 0x102   : > { %479 = vrot.lane.b32.xlu1 %v7566_v25, %s7424_s10  ;;  %489 = vrot.lane.b32.xlu0 %v7557_v22, %s7423_s9  ;;  %v7674_v38 = vmul.f32 0.35355338, %v7627_v34 }
 0x103   : > { %v7677_v39 = vmul.f32 0.35355338, %v7637_v35 }
 0x106   : > { %495 = vrot.lane.b32.xlu1 %v7566_v25, %s7423_s9  ;;  %505 = vrot.lane.b32.xlu0 %v7557_v22, %s7425_s11 }
 0x10a   : > { %511 = vrot.lane.b32.xlu1 %v7566_v25, %s7425_s11  ;;  %521 = vrot.lane.b32.xlu0 %v7557_v22, %s7426_s12 }
 0x10e   : > { %750 = vrot.lane.b32.xlu1 %v7566_v25, %s7426_s12  ;;  %417 = vrot.lane.b32.xlu0 %v7585_v28, %s7424_s10 }
 0x112   : > { %477 = vrot.lane.b32.xlu1 %v7591_v29, %s7424_s10  ;;  %493 = vrot.lane.b32.xlu0 %v7591_v29, %s7423_s9 }
 0x116   : > { %674 = vrot.lane.b32.xlu1 %v7591_v29, %s7426_s12  ;;  %509 = vrot.lane.b32.xlu0 %v7591_v29, %s7425_s11 }
 0x11a   : > { %423 = vrot.lane.b32.xlu1 %v7602_v30, %s7424_s10  ;;  %421 = vrot.lane.b32.xlu0 %v7605_v31, %s7424_s10 }
 0x11e   : > { %483 = vrot.lane.b32.xlu1 %v7607_v32, %s7424_s10  ;;  %515 = vrot.lane.b32.xlu0 %v7607_v32, %s7425_s11 }
 0x122   : > { %499 = vrot.lane.b32.xlu1 %v7607_v32, %s7423_s9  ;;  %481 = vrot.lane.b32.xlu0 %v7617_v33, %s7424_s10 }
 0x126   : > { %902 = vrot.lane.b32.xlu1 %v7607_v32, %s7426_s12  ;;  %497 = vrot.lane.b32.xlu0 %v7617_v33, %s7423_s9 }
 0x12a   : > { %513 = vrot.lane.b32.xlu1 %v7617_v33, %s7425_s11  ;;  %826 = vrot.lane.b32.xlu0 %v7617_v33, %s7426_s12 }
 0x12e   : > { %487 = vrot.lane.b32.xlu1 %v7627_v34, %s7424_s10  ;;  %519 = vrot.lane.b32.xlu0 %v7627_v34, %s7425_s11 }
 0x132   : > { %503 = vrot.lane.b32.xlu1 %v7627_v34, %s7423_s9  ;;  %485 = vrot.lane.b32.xlu0 %v7637_v35, %s7424_s10 }
 0x136   : > { %1054 = vrot.lane.b32.xlu1 %v7627_v34, %s7426_s12  ;;  %425 = vrot.lane.b32.xlu0 %v7644_v36, %s7424_s10 }
 0x13a   : > { %427 = vrot.lane.b32.xlu1 %v7651_v37, %s7424_s10  ;;  %433 = vrot.lane.b32.xlu0 %v7585_v28, %s7423_s9 }
 0x13e   : > { %435 = vrot.lane.b32.xlu1 %v7560_v23, %s7423_s9  ;;  %437 = vrot.lane.b32.xlu0 %v7605_v31, %s7423_s9 }
 0x142   : > { %439 = vrot.lane.b32.xlu1 %v7602_v30, %s7423_s9  ;;  %501 = vrot.lane.b32.xlu0 %v7637_v35, %s7423_s9 }
 0x146   : > { %443 = vrot.lane.b32.xlu1 %v7651_v37, %s7423_s9  ;;  %441 = vrot.lane.b32.xlu0 %v7644_v36, %s7423_s9 }
 0x14a   : > { %517 = vrot.lane.b32.xlu1 %v7637_v35, %s7425_s11  ;;  %978 = vrot.lane.b32.xlu0 %v7637_v35, %s7426_s12 }
 0x14e   : > { %431 = vrot.lane.b32.xlu1 %v7674_v38, %s7424_s10  ;;  %429 = vrot.lane.b32.xlu0 %v7677_v39, %s7424_s10 }
 0x152   : > { %447 = vrot.lane.b32.xlu1 %v7674_v38, %s7423_s9  ;;  %445 = vrot.lane.b32.xlu0 %v7677_v39, %s7423_s9  ;;  %s7432_s9 = smov 24  }
 0x168   : > { %v7687_v40 = vpop.permute.xlu1 %491  ;;  %v7689_v41 = vpop.permute.xlu0 %475 }
 0x169   : > { %1206 = vrot.lane.b32.xlu1 %v7689_v41, %s7426_s12 }
 0x16c   : > { %v7693_v42 = vpop.permute.xlu1 %507  ;;  %v599_v43 = vpop.permute.xlu0 %598 }
 0x16d   : > { %1814 = vrot.lane.b32.xlu1 %v7687_v40, %s7426_s12 }
 0x170   : > { %v7697_v44 = vpop.permute.xlu1 %419  ;;  %v7699_v45 = vpop.permute.xlu0 %473 }
 0x171   : > { %1130 = vrot.lane.b32.xlu0 %v7699_v45, %s7426_s12 }
 0x174   : > { %v7703_v46 = vpop.permute.xlu1 %479  ;;  %v7705_v47 = vpop.permute.xlu0 %489 }
 0x175   : > { %1358 = vrot.lane.b32.xlu1 %v7703_v46, %s7426_s12  ;;  %1738 = vrot.lane.b32.xlu0 %v7705_v47, %s7426_s12 }
 0x178   : > { %v7711_v48 = vpop.permute.xlu1 %495  ;;  %v7713_v49 = vpop.permute.xlu0 %505 }
 0x179   : > { %1966 = vrot.lane.b32.xlu1 %v7711_v48, %s7426_s12 }
 0x17c   : > { %v7717_v50 = vpop.permute.xlu1 %511  ;;  %v522_v51 = vpop.permute.xlu0 %521 }
 0x17d   : > { %6790 = vmatpush3.xpose.msk.msra.mxu0 %vm523_vm2, %v522_v51 }
 0x17e   : > { %6794 = vmatprep.subr.mxu0 %v8878_v21 }
 0x180   : > { %v751_v52 = vpop.permute.xlu1 %750  ;;  %v7721_v53 = vpop.permute.xlu0 %417  ;;  %6792 = vmatmul.mubr.msk.f32.vlgmr.msra.gmra.mrb[8].mxu0 %vm523_vm2, %v7585_v28 }
 0x181   : > { %6795 = vmatpush3.xpose.msk.msra.mxu0 %vm523_vm2, %v599_v43  ;;  %6796 = vmatprep.mubr.msk.f32.mxu0 %vm7428_vm1, %v8878_v21 }
 0x182   : > { %6814 = vmatprep.subr.mxu0 %v8878_v21 }
 0x184   : > { %v7729_v54 = vpop.permute.xlu1 %477  ;;  %v7731_v55 = vpop.permute.xlu0 %493  ;;  %6797 = vmatmul.mubr.msk.f32.vlgmr.msra.gmra.mrb[10].mxu0 %vm523_vm2, %v7560_v23 }
 0x185   : > { %1282 = vrot.lane.b32.xlu0 %v7729_v54, %s7426_s12  ;;  %6816 = vmatprep.mubr.msk.f32.mxu0 %vm7428_vm1, %v8878_v21 }
 0x188   : > { %v675_v56 = vpop.permute.xlu1 %674  ;;  %v7739_v57 = vpop.permute.xlu0 %509 }
 0x189   : > { %6800 = vmatpush3.xpose.msk.msra.mxu1 %vm523_vm2, %v675_v56  ;;  %1890 = vrot.lane.b32.xlu0 %v7731_v55, %s7426_s12 }
 0x18a   : > { %6804 = vmatprep.subr.mxu1 %v8878_v21 }
 0x18c   : > { %v7745_v58 = vpop.permute.xlu1 %423  ;;  %6802 = vmatmul.mubr.msk.f32.vlgmr.msra.gmra.mrb[0].mxu1 %vm523_vm2, %v7605_v31  ;;  %v7749_v59 = vpop.permute.xlu0 %421 }
 0x18d   : > { %6805 = vmatpush3.xpose.msk.msra.mxu1 %vm523_vm2, %v751_v52  ;;  %6806 = vmatprep.mubr.msk.f32.mxu1 %vm7428_vm1, %v8878_v21 }
 0x18e   : > { %6809 = vmatprep.subr.mxu1 %v8878_v21 }
 0x190   : > { %v7755_v60 = vpop.permute.xlu1 %483  ;;  %6807 = vmatmul.mubr.msk.f32.vlgmr.msra.gmra.mrb[2].mxu1 %vm523_vm2, %v7602_v30  ;;  %v7759_v61 = vpop.permute.xlu0 %515 }
 0x191   : > { %1510 = vrot.lane.b32.xlu1 %v7755_v60, %s7426_s12  ;;  %6811 = vmatprep.mubr.msk.f32.mxu1 %vm7428_vm1, %v8878_v21 }
 0x194   : > { %v7765_v62 = vpop.permute.xlu1 %499  ;;  %v7767_v63 = vpop.permute.xlu0 %481 }
 0x195   : > { %2118 = vrot.lane.b32.xlu1 %v7765_v62, %s7426_s12  ;;  %1434 = vrot.lane.b32.xlu0 %v7767_v63, %s7426_s12 }
 0x198   : > { %v903_v0 = vpop.permute.xlu1 %902  ;;  %v7773_v1 = vpop.permute.xlu0 %497 }
 0x199   : > { %2042 = vrot.lane.b32.xlu0 %v7773_v1, %s7426_s12  ;;  %6815 = vmatpush3.xpose.msk.msra.mxu0 %vm523_vm2, %v903_v0 }
 0x19a   : > { %6824 = vmatprep.subr.mxu0 %v8878_v21 }
 0x19c   : > { %v7779_v2 = vpop.permute.xlu1 %513  ;;  %v827_v3 = vpop.permute.xlu0 %826  ;;  %6817 = vmatmul.mubr.msk.f32.vlgmr.msra.gmra.mrb[12].mxu0 %vm523_vm2, %v7651_v37 }
 0x19d   : > { %6810 = vmatpush3.xpose.msk.msra.mxu1 %vm523_vm2, %v827_v3  ;;  %6826 = vmatprep.mubr.msk.f32.mxu0 %vm7428_vm1, %v8878_v21 }
 0x19e   : > { %6819 = vmatprep.subr.mxu1 %v8878_v21 }
 0x1a0   : > { %v7787_v4 = vpop.permute.xlu1 %487  ;;  %6812 = vmatmul.mubr.msk.f32.vlgmr.msra.gmra.mrb[4].mxu1 %vm523_vm2, %v7644_v36  ;;  %v7791_v5 = vpop.permute.xlu0 %519 }
 0x1a1   : > { %1662 = vrot.lane.b32.xlu1 %v7787_v4, %s7426_s12  ;;  %6821 = vmatprep.mubr.msk.f32.mxu1 %vm7428_vm1, %v8878_v21 }
 0x1a4   : > { %v7797_v6 = vpop.permute.xlu1 %503  ;;  %v7799_v7 = vpop.permute.xlu0 %485 }
 0x1a5   : > { %2270 = vrot.lane.b32.xlu1 %v7797_v6, %s7426_s12  ;;  %1586 = vrot.lane.b32.xlu0 %v7799_v7, %s7426_s12 }
 0x1a8   : > { %v1055_v8 = vpop.permute.xlu1 %1054  ;;  %v7805_v9 = vpop.permute.xlu0 %425 }
 0x1a9   : > { %2422 = vrot.lane.b32.xlu1 %v7693_v42, %s7426_s12  ;;  %2346 = vrot.lane.b32.xlu0 %v7713_v49, %s7426_s12 }
 0x1aa   : > { %6825 = vmatpush3.xpose.msk.msra.mxu0 %vm523_vm2, %v1055_v8 }
 0x1ab   : > { %6834 = vmatprep.subr.mxu0 %v8878_v21 }
 0x1ac   : > { %v7813_v10 = vpop.permute.xlu0 %433  ;;  %v7815_v11 = vpop.permute.xlu1 %427 }
 0x1ad   : > { %6827 = vmatmul.mubr.msk.f32.vlgmr.msra.gmra.mrb[14].mxu0 %vm523_vm2, %v7674_v38  ;;  %451 = vrot.lane.b32.xlu1 %v7560_v23, %s7425_s11 }
 0x1ae   : > { %449 = vrot.lane.b32.xlu0 %v7585_v28, %s7425_s11  ;;  %6836 = vmatprep.mubr.msk.f32.mxu0 %vm7428_vm1, %v8878_v21 }
 0x1b0   : > { %v7825_v12 = vpop.permute.xlu0 %437  ;;  %v7831_v13 = vpop.permute.xlu1 %435 }
 0x1b1   : > { %2574 = vrot.lane.b32.xlu1 %v7717_v50, %s7426_s12 }
 0x1b2   : > { %2498 = vrot.lane.b32.xlu0 %v7739_v57, %s7426_s12 }
 0x1b4   : > { %v7833_v14 = vpop.permute.xlu0 %501  ;;  %v7841_v17 = vpop.permute.xlu1 %439 }
 0x1b5   : > { %455 = vrot.lane.b32.xlu1 %v7602_v30, %s7425_s11 }
 0x1b6   : > { %2194 = vrot.lane.b32.xlu0 %v7833_v14, %s7426_s12 }
 0x1b8   : > { %v7839_v15 = vpop.permute.xlu0 %441  ;;  %v7853_v19 = vpop.permute.xlu1 %443 }
 0x1b9   : > { %2726 = vrot.lane.b32.xlu1 %v7759_v61, %s7426_s12 }
 0x1ba   : > { %453 = vrot.lane.b32.xlu0 %v7605_v31, %s7425_s11 }
 0x1bc   : > { %v979_v18 = vpop.permute.xlu0 %978  ;;  %v7863_v20 = vpop.permute.xlu1 %517 }
 0x1bd   : > { %459 = vrot.lane.b32.xlu1 %v7651_v37, %s7425_s11  ;;  %6820 = vmatpush3.xpose.msk.msra.mxu1 %vm523_vm2, %v979_v18 }
 0x1be   : > { %2650 = vrot.lane.b32.xlu0 %v7779_v2, %s7426_s12  ;;  %6829 = vmatprep.subr.mxu1 %v8878_v21 }
 0x1c0   : > { %6822 = vmatmul.mubr.msk.f32.vlgmr.msra.gmra.mrb[6].mxu1 %vm523_vm2, %v7677_v39  ;;  %v7877_v23 = vpop.permute.xlu1 %431  ;;  %v7889_v24 = vpop.permute.xlu0 %429 }
 0x1c1   : > { %2878 = vrot.lane.b32.xlu1 %v7791_v5, %s7426_s12  ;;  %6831 = vmatprep.mubr.msk.f32.mxu1 %vm7428_vm1, %v8878_v21 }
 0x1c2   : > { %457 = vrot.lane.b32.xlu0 %v7644_v36, %s7425_s11 }
 0x1c5   : > { %463 = vrot.lane.b32.xlu1 %v7674_v38, %s7425_s11 }
 0x1c6   : > { %2802 = vrot.lane.b32.xlu0 %v7863_v20, %s7426_s12 }
 0x1c9   : > { %3306 = vrot.lane.b32.xlu1 %v7557_v22, %s7429_s13  ;;  %v7887_v22 = vpop.permute.xlu1 %447 }
 0x1ca   : > { %461 = vrot.lane.b32.xlu0 %v7677_v39, %s7425_s11 }
 0x1cd   : > { %3458 = vrot.lane.b32.xlu1 %v7591_v29, %s7429_s13 }
 0x1ce   : > { %3382 = vrot.lane.b32.xlu0 %v7545_v16, %s7429_s13 }
 0x1d1   : > { %3610 = vrot.lane.b32.xlu1 %v7617_v33, %s7429_s13 }
 0x1d2   : > { %3534 = vrot.lane.b32.xlu0 %v7566_v25, %s7429_s13  ;;  %v7901_v25 = vpop.permute.xlu0 %445 }
 0x1d5   : > { %3762 = vrot.lane.b32.xlu1 %v7637_v35, %s7429_s13 }
 0x1d6   : > { %3686 = vrot.lane.b32.xlu0 %v7607_v32, %s7429_s13 }
 0x1d9   : > { %3914 = vrot.lane.b32.xlu1 %v7699_v45, %s7429_s13 }
 0x1da   : > { %3838 = vrot.lane.b32.xlu0 %v7627_v34, %s7429_s13 }
 0x1db   : > { %v1207_v16 = vpop.permute.xlu1 %1206 }
 0x1dc   : > { %6835 = vmatpush3.xpose.msk.msra.mxu0 %vm523_vm2, %v1207_v16 }
 0x1dd   : > { %4066 = vrot.lane.b32.xlu1 %v7729_v54, %s7429_s13  ;;  %6844 = vmatprep.subr.mxu0 %v8878_v21 }
 0x1de   : > { %3990 = vrot.lane.b32.xlu0 %v7689_v41, %s7429_s13 }
 0x1df   : > { %6837 = vmatmul.mubr.msk.f32.vlgmr.msra.gmra.mrb[16].mxu0 %vm523_vm2, %v7697_v44  ;;  %v1815_v26 = vpop.permute.xlu1 %1814 }
 0x1e0   : > { %6846 = vmatprep.mubr.msk.f32.mxu0 %vm7428_vm1, %v8878_v21 }
 0x1e1   : > { %4218 = vrot.lane.b32.xlu1 %v7767_v63, %s7429_s13 }
 0x1e2   : > { %4142 = vrot.lane.b32.xlu0 %v7703_v46, %s7429_s13 }
 0x1e3   : > { %v1131_v27 = vpop.permute.xlu0 %1130 }
 0x1e4   : > { %6830 = vmatpush3.xpose.msk.msra.mxu1 %vm523_vm2, %v1131_v27 }
 0x1e5   : > { %4522 = vrot.lane.b32.xlu1 %v7705_v47, %s7429_s13  ;;  %6839 = vmatprep.subr.mxu1 %v8878_v21 }
 0x1e6   : > { %4294 = vrot.lane.b32.xlu0 %v7755_v60, %s7429_s13 }
 0x1e7   : > { %v1359_v28 = vpop.permute.xlu1 %1358  ;;  %6832 = vmatmul.mubr.msk.f32.vlgmr.msra.gmra.mrb[8].mxu1 %vm523_vm2, %v7721_v53  ;;  %v1739_v29 = vpop.permute.xlu0 %1738 }
 0x1e8   : > { %6845 = vmatpush3.xpose.msk.msra.mxu0 %vm523_vm2, %v1359_v28  ;;  %6841 = vmatprep.mubr.msk.f32.mxu1 %vm7428_vm1, %v8878_v21 }
 0x1e9   : > { %4674 = vrot.lane.b32.xlu1 %v7731_v55, %s7429_s13  ;;  %6854 = vmatprep.subr.mxu0 %v8878_v21 }
 0x1ea   : > { %4446 = vrot.lane.b32.xlu0 %v7787_v4, %s7429_s13 }
 0x1eb   : > { %6847 = vmatmul.mubr.msk.f32.vlgmr.msra.gmra.mrb[18].mxu0 %vm523_vm2, %v7745_v58  ;;  %v1967_v31 = vpop.permute.xlu1 %1966 }
 0x1ec   : > { %6856 = vmatprep.mubr.msk.f32.mxu0 %vm7428_vm1, %v8878_v21 }
 0x1ed   : > { %4826 = vrot.lane.b32.xlu1 %v7773_v1, %s7429_s13 }
 0x1ee   : > { %4598 = vrot.lane.b32.xlu0 %v7687_v40, %s7429_s13 }
 0x1f1   : > { %4902 = vrot.lane.b32.xlu1 %v7765_v62, %s7429_s13 }
 0x1f2   : > { %4750 = vrot.lane.b32.xlu0 %v7711_v48, %s7429_s13 }
 0x1f5   : > { %4370 = vrot.lane.b32.xlu1 %v7799_v7, %s7429_s13 }
 0x1f6   : > { %4978 = vrot.lane.b32.xlu0 %v7833_v14, %s7429_s13 }
 0x1f7   : > { %v1283_v30 = vpop.permute.xlu0 %1282 }
 0x1f8   : > { %6840 = vmatpush3.xpose.msk.msra.mxu1 %vm523_vm2, %v1283_v30 }
 0x1f9   : > { %5054 = vrot.lane.b32.xlu1 %v7797_v6, %s7429_s13  ;;  %6849 = vmatprep.subr.mxu1 %v8878_v21 }
 0x1fa   : > { %5130 = vrot.lane.b32.xlu0 %v7713_v49, %s7429_s13 }
 0x1fb   : > { %6842 = vmatmul.mubr.msk.f32.vlgmr.msra.gmra.mrb[10].mxu1 %vm523_vm2, %v7749_v59  ;;  %v1891_v32 = vpop.permute.xlu0 %1890 }
 0x1fc   : > { %6851 = vmatprep.mubr.msk.f32.mxu1 %vm7428_vm1, %v8878_v21 }
 0x1fd   : > { %5206 = vrot.lane.b32.xlu1 %v7693_v42, %s7429_s13 }
 0x1fe   : > { %5282 = vrot.lane.b32.xlu0 %v7739_v57, %s7429_s13 }
 0x201   : > { %5358 = vrot.lane.b32.xlu1 %v7717_v50, %s7429_s13 }
 0x203   : > { %v1511_v33 = vpop.permute.xlu1 %1510 }
 0x204   : > { %6855 = vmatpush3.xpose.msk.msra.mxu0 %vm523_vm2, %v1511_v33 }
 0x205   : > { %6864 = vmatprep.subr.mxu0 %v8878_v21 }
 0x207   : > { %v1435_v34 = vpop.permute.xlu0 %1434  ;;  %6857 = vmatmul.mubr.msk.f32.vlgmr.msra.gmra.mrb[20].mxu0 %vm523_vm2, %v7815_v11  ;;  %v2119_v35 = vpop.permute.xlu1 %2118 }
 0x208   : > { %6850 = vmatpush3.xpose.msk.msra.mxu1 %vm523_vm2, %v1435_v34  ;;  %6866 = vmatprep.mubr.msk.f32.mxu0 %vm7428_vm1, %v8878_v21 }
 0x209   : > { %6859 = vmatprep.subr.mxu1 %v8878_v21 }
 0x20b   : > { %6852 = vmatmul.mubr.msk.f32.vlgmr.msra.gmra.mrb[12].mxu1 %vm523_vm2, %v7805_v9  ;;  %v2043_v36 = vpop.permute.xlu0 %2042 }
 0x20c   : > { %6861 = vmatprep.mubr.msk.f32.mxu1 %vm7428_vm1, %v8878_v21 }
 0x213   : > { %v1663_v37 = vpop.permute.xlu1 %1662 }
 0x214   : > { %6865 = vmatpush3.xpose.msk.msra.mxu0 %vm523_vm2, %v1663_v37 }
 0x215   : > { %6874 = vmatprep.subr.mxu0 %v8878_v21 }
 0x217   : > { %v2271_v38 = vpop.permute.xlu1 %2270  ;;  %v1587_v39 = vpop.permute.xlu0 %1586  ;;  %6867 = vmatmul.mubr.msk.f32.vlgmr.msra.gmra.mrb[22].mxu0 %vm523_vm2, %v7877_v23 }
 0x218   : > { %6860 = vmatpush3.xpose.msk.msra.mxu1 %vm523_vm2, %v1587_v39  ;;  %6875 = vmatpush3.xpose.msk.msra.mxu0 %vm523_vm2, %v1815_v26 }
 0x219   : > { %6876 = vmatprep.mubr.msk.f32.mxu0 %vm7428_vm1, %v8878_v21  ;;  %6869 = vmatprep.subr.mxu1 %v8878_v21 }
 0x21a   : > { %6884 = vmatprep.subr.mxu0 %v8878_v21 }
 0x21b   : > { %v2423_v40 = vpop.permute.xlu1 %2422  ;;  %6862 = vmatmul.mubr.msk.f32.vlgmr.msra.gmra.mrb[14].mxu1 %vm523_vm2, %v7889_v24  ;;  %v2347_v41 = vpop.permute.xlu0 %2346  ;;  %6877 = vmatmul.mubr.msk.f32.vlgmr.msra.gmra.mrb[24].mxu0 %vm523_vm2, %v7831_v13 }
 0x21c   : > { %6870 = vmatpush3.xpose.msk.msra.mxu1 %vm523_vm2, %v1739_v29  ;;  %6885 = vmatpush3.xpose.msk.msra.mxu0 %vm523_vm2, %v1967_v31 }
 0x21d   : > { %6871 = vmatprep.mubr.msk.f32.mxu1 %vm7428_vm1, %v8878_v21  ;;  %6886 = vmatprep.mubr.msk.f32.mxu0 %vm7428_vm1, %v8878_v21 }
 0x21e   : > { %6879 = vmatprep.subr.mxu1 %v8878_v21  ;;  %6894 = vmatprep.subr.mxu0 %v8878_v21 }
 0x21f   : > { %v452_v42 = vpop.permute.xlu1 %451  ;;  %6872 = vmatmul.mubr.msk.f32.vlgmr.msra.gmra.mrb[16].mxu1 %vm523_vm2, %v7813_v10  ;;  %6887 = vmatmul.mubr.msk.f32.vlgmr.msra.gmra.mrb[26].mxu0 %vm523_vm2, %v7841_v17 }
 0x220   : > { %v450_v43 = vpop.permute.xlu0 %449  ;;  %6880 = vmatpush3.xpose.msk.msra.mxu1 %vm523_vm2, %v1891_v32  ;;  %6895 = vmatpush3.xpose.msk.msra.mxu0 %vm523_vm2, %v2119_v35 }
 0x221   : > { %6881 = vmatprep.mubr.msk.f32.mxu1 %vm7428_vm1, %v8878_v21  ;;  %6896 = vmatprep.mubr.msk.f32.mxu0 %vm7428_vm1, %v8878_v21 }
 0x222   : > { %6889 = vmatprep.subr.mxu1 %v8878_v21  ;;  %6904 = vmatprep.subr.mxu0 %v8878_v21 }
 0x223   : > { %v2575_v44 = vpop.permute.xlu1 %2574  ;;  %6882 = vmatmul.mubr.msk.f32.vlgmr.msra.gmra.mrb[18].mxu1 %vm523_vm2, %v7825_v12  ;;  %6897 = vmatmul.mubr.msk.f32.vlgmr.msra.gmra.mrb[28].mxu0 %vm523_vm2, %v7853_v19 }
 0x224   : > { %v2499_v45 = vpop.permute.xlu0 %2498  ;;  %6890 = vmatpush3.xpose.msk.msra.mxu1 %vm523_vm2, %v2043_v36  ;;  %6905 = vmatpush3.xpose.msk.msra.mxu0 %vm523_vm2, %v2271_v38 }
 0x225   : > { %6891 = vmatprep.mubr.msk.f32.mxu1 %vm7428_vm1, %v8878_v21  ;;  %6906 = vmatprep.mubr.msk.f32.mxu0 %vm7428_vm1, %v8878_v21 }
 0x226   : > { %6899 = vmatprep.subr.mxu1 %v8878_v21  ;;  %6914 = vmatprep.subr.mxu0 %v8878_v21 }
 0x227   : > { %v456_v46 = vpop.permute.xlu1 %455  ;;  %6892 = vmatmul.mubr.msk.f32.vlgmr.msra.gmra.mrb[20].mxu1 %vm523_vm2, %v7839_v15  ;;  %6907 = vmatmul.mubr.msk.f32.vlgmr.msra.gmra.mrb[30].mxu0 %vm523_vm2, %v7887_v22 }
 0x228   : > { %v2195_v47 = vpop.permute.xlu0 %2194  ;;  %6915 = vmatpush3.xpose.msk.msra.mxu0 %vm523_vm2, %v2423_v40  ;;  %6901 = vmatprep.mubr.msk.f32.mxu1 %vm7428_vm1, %v8878_v21 }
 0x229   : > { %6900 = vmatpush3.xpose.msk.msra.mxu1 %vm523_vm2, %v2195_v47  ;;  %6916 = vmatprep.mubr.msk.f32.mxu0 %vm7428_vm1, %v8878_v21 }
 0x22a   : > { %6909 = vmatprep.subr.mxu1 %v8878_v21  ;;  %6924 = vmatprep.subr.mxu0 %v8878_v21 }
 0x22b   : > { %v2727_v48 = vpop.permute.xlu1 %2726  ;;  %6917 = vmatmul.mubr.msk.f32.vlgmr.msra.gmra.mrb[32].mxu0 %vm523_vm2, %v452_v42 }
 0x22c   : > { %6902 = vmatmul.mubr.msk.f32.vlgmr.msra.gmra.mrb[22].mxu1 %vm523_vm2, %v7901_v25  ;;  %v454_v49 = vpop.permute.xlu0 %453  ;;  %6925 = vmatpush3.xpose.msk.msra.mxu0 %vm523_vm2, %v2575_v44 }
 0x22d   : > { %6910 = vmatpush3.xpose.msk.msra.mxu1 %vm523_vm2, %v2347_v41  ;;  %6911 = vmatprep.mubr.msk.f32.mxu1 %vm7428_vm1, %v8878_v21 }
 0x22e   : > { %6926 = vmatprep.mubr.msk.f32.mxu0 %vm7428_vm1, %v8878_v21  ;;  %6919 = vmatprep.subr.mxu1 %v8878_v21 }
 0x22f   : > { %v460_v50 = vpop.permute.xlu1 %459  ;;  %6927 = vmatmul.mubr.msk.f32.vlgmr.msra.gmra.mrb[34].mxu0 %vm523_vm2, %v456_v46  ;;  %6934 = vmatprep.subr.mxu0 %v8878_v21 }
 0x230   : > { %6912 = vmatmul.mubr.msk.f32.vlgmr.msra.gmra.mrb[24].mxu1 %vm523_vm2, %v450_v43  ;;  %v2651_v51 = vpop.permute.xlu0 %2650  ;;  %6935 = vmatpush3.xpose.msk.msra.mxu0 %vm523_vm2, %v2727_v48 }
 0x231   : > { %6920 = vmatpush3.xpose.msk.msra.mxu1 %vm523_vm2, %v2499_v45  ;;  %6921 = vmatprep.mubr.msk.f32.mxu1 %vm7428_vm1, %v8878_v21 }
 0x232   : > { %6936 = vmatprep.mubr.msk.f32.mxu0 %vm7428_vm1, %v8878_v21  ;;  %6929 = vmatprep.subr.mxu1 %v8878_v21 }
 0x233   : > { %v2879_v52 = vpop.permute.xlu1 %2878  ;;  %6937 = vmatmul.mubr.msk.f32.vlgmr.msra.gmra.mrb[36].mxu0 %vm523_vm2, %v460_v50  ;;  %6944 = vmatprep.subr.mxu0 %v8878_v21 }
 0x234   : > { %6922 = vmatmul.mubr.msk.f32.vlgmr.msra.gmra.mrb[26].mxu1 %vm523_vm2, %v454_v49  ;;  %v458_v53 = vpop.permute.xlu0 %457  ;;  %6945 = vmatpush3.xpose.msk.msra.mxu0 %vm523_vm2, %v2879_v52 }
 0x235   : > { %6930 = vmatpush3.xpose.msk.msra.mxu1 %vm523_vm2, %v2651_v51  ;;  %6931 = vmatprep.mubr.msk.f32.mxu1 %vm7428_vm1, %v8878_v21 }
 0x236   : > { %6939 = vmatprep.subr.mxu1 %v8878_v21  ;;  %6946 = vmatprep.mubr.msk.f32.mxu0 %vm7428_vm1, %v8878_v21 }
 0x237   : > { %v464_v54 = vpop.permute.xlu1 %463  ;;  %6954 = vmatprep.subr.mxu0 %v8878_v21 }
 0x238   : > { %6932 = vmatmul.mubr.msk.f32.vlgmr.msra.gmra.mrb[28].mxu1 %vm523_vm2, %v458_v53  ;;  %v2803_v55 = vpop.permute.xlu0 %2802  ;;  %6947 = vmatmul.mubr.msk.f32.vlgmr.msra.gmra.mrb[38].mxu0 %vm523_vm2, %v464_v54 }
 0x239   : > { %6940 = vmatpush3.xpose.msk.msra.mxu1 %vm523_vm2, %v2803_v55  ;;  %6941 = vmatprep.mubr.msk.f32.mxu1 %vm7428_vm1, %v8878_v21 }
 0x23a   : > { %6949 = vmatprep.subr.mxu1 %v8878_v21  ;;  %6956 = vmatprep.mubr.msk.f32.mxu0 %vm7428_vm1, %v8878_v21 }
 0x23b   : > { %v3307_v56 = vpop.permute.xlu1 %3306 }
 0x23c   : > { %v462_v57 = vpop.permute.xlu0 %461 }
 0x23d   : > { %6942 = vmatmul.mubr.msk.f32.vlgmr.msra.gmra.mrb[30].mxu1 %vm523_vm2, %v462_v57 }
 0x23e   : > { %6950 = vmatpush3.msra.mxu1 %v3307_v56  ;;  %6951 = vmatprep.mubr.msk.f32.mxu1 %vm7428_vm1, %v8878_v21 }
 0x23f   : > { %6959 = vmatprep.subr.mxu1 %v8878_v21  ;;  %v8133_v42 = vpop.permute.xlu1 %3458 }
 0x240   : > { %v3383_v58 = vpop.permute.xlu0 %3382 }
 0x241   : > { %6955 = vmatpush3.msra.mxu0 %v3383_v58 }
 0x242   : > { %6964 = vmatprep.subr.mxu0 %v8878_v21 }
 0x243   : > { %v8137_v44 = vpop.permute.xlu1 %3610 }
 0x244   : > { %v8105_v16 = vpop.permute.xlu0 %3534 }
 0x247   : > { %v8149_v52 = vpop.permute.xlu1 %3762 }
 0x248   : > { %v8111_v28 = vpop.permute.xlu0 %3686 }
 0x24b   : > { %v8153_v54 = vpop.permute.xlu1 %3914 }
 0x24c   : > { %v8117_v32 = vpop.permute.xlu0 %3838 }
 0x250   : > { %v8123_v36 = vpop.permute.xlu0 %3990 }
 0x253   : > { %v8073_v59 = vpop.f32.mrb[8].mxu0 }
 0x254   : > { %v6793_v60 = vpop.f32.mrb[9].mxu0  ;;  %v2954_v62 = vsel %vm523_vm2, %v8073_v59, -inf  ;;  %v8125_v37 = vpop.permute.xlu0 %4142 }
 0x255   : > { %2955 = vmax.xlane.f32.xlu0 %v2954_v62  ;;  %v8161_v60 = vpop.permute.xlu1 %4066 }
 0x257   : > { %v8077_v63 = vpop.f32.mrb[10].mxu0 }
 0x258   : > { %v6798_v0 = vpop.f32.mrb[11].mxu0  ;;  %v2957_v1 = vsel %vm523_vm2, %v8077_v63, -inf  ;;  %v8131_v41 = vpop.permute.xlu0 %4294 }
 0x259   : > { %2958 = vmax.xlane.f32.xlu1 %v2957_v1 }
 0x25c   : > { %v8135_v43 = vpop.permute.xlu0 %4446 }
 0x25f   : > { %v8081_v3 = vpop.f32.mrb[0].mxu1 }
 0x260   : > { %v6803_v4 = vpop.f32.mrb[1].mxu1  ;;  %v2960_v6 = vsel %vm523_vm2, %v8081_v3, -inf  ;;  %v8143_v48 = vpop.permute.xlu0 %4598 }
 0x261   : > { %2961 = vmax.xlane.f32.xlu0 %v2960_v6 }
 0x263   : > { %v8085_v7 = vpop.f32.mrb[2].mxu1 }
 0x264   : > { %v6808_v8 = vpop.f32.mrb[3].mxu1  ;;  %v2963_v9 = vsel %vm523_vm2, %v8085_v7, -inf  ;;  %v8151_v53 = vpop.permute.xlu0 %4750 }
 0x265   : > { %2964 = vmax.xlane.f32.xlu0 %v2963_v9  ;;  %8882 = vst [vmem:[#allocation5_spill] sm:$0xff] %v8151_v53 }
 0x268   : > { %v8155_v55 = vpop.permute.xlu0 %4978 }
 0x269   : > { %8883 = vst [vmem:[#allocation6_spill] sm:$0xff] %v8155_v55 }
 0x26c   : > { %v8163_v62 = vpop.permute.xlu0 %5130 }
 0x26d   : > { %8884 = vst [vmem:[#allocation7_spill] sm:$0xff] %v8163_v62 }
 0x26f   : > { %v8089_v10 = vpop.f32.mrb[12].mxu0 }
 0x270   : > { %v6818_v11 = vpop.f32.mrb[13].mxu0  ;;  %v2969_v12 = vsel %vm523_vm2, %v8089_v10, -inf }
 0x271   : > { %2970 = vmax.xlane.f32.xlu0 %v2969_v12  ;;  %v8173_v11 = vpop.permute.xlu1 %4218 }
 0x273   : > { %v8093_v13 = vpop.f32.mrb[4].mxu1 }
 0x274   : > { %v6813_v14 = vpop.f32.mrb[5].mxu1  ;;  %v2966_v15 = vsel %vm523_vm2, %v8093_v13, -inf }
 0x275   : > { %2967 = vmax.xlane.f32.xlu1 %v2966_v15 }
 0x280   : > { %v8097_v17 = vpop.f32.mrb[14].mxu0 }
 0x281   : > { %v6828_v18 = vpop.f32.mrb[15].mxu0  ;;  %v2975_v19 = vsel %vm523_vm2, %v8097_v17, -inf }
 0x282   : > { %2976 = vmax.xlane.f32.xlu0 %v2975_v19  ;;  %v8181_v19 = vpop.permute.xlu0 %5282 }
 0x283   : > { %8885 = vst [vmem:[#allocation8_spill] sm:$0xff] %v8181_v19 }
 0x293   : > { %v8101_v23 = vpop.f32.mrb[6].mxu1 }
 0x294   : > { %v6823_v22 = vpop.f32.mrb[7].mxu1  ;;  %v2972_v24 = vsel %vm523_vm2, %v8101_v23, -inf }
 0x295   : > { %2973 = vmax.xlane.f32.xlu1 %v2972_v24 }
 0x2b2   : > { %v8107_v25 = vpop.f32.mrb[16].mxu0 }
 0x2b3   : > { %v6838_v26 = vpop.f32.mrb[17].mxu0  ;;  %v2981_v27 = vsel %vm523_vm2, %v8107_v25, -inf }
 0x2b4   : > { %2982 = vmax.xlane.f32.xlu0 %v2981_v27 }
 0x2ba   : > { %v8113_v29 = vpop.f32.mrb[8].mxu1 }
 0x2bb   : > { %v6833_v30 = vpop.f32.mrb[9].mxu1  ;;  %v2978_v31 = vsel %vm523_vm2, %v8113_v29, -inf }
 0x2bc   : > { %2979 = vmax.xlane.f32.xlu1 %v2978_v31 }
 0x2be   : > { %v8119_v33 = vpop.f32.mrb[18].mxu0 }
 0x2bf   : > { %v6848_v34 = vpop.f32.mrb[19].mxu0  ;;  %v2987_v35 = vsel %vm523_vm2, %v8119_v33, -inf }
 0x2c0   : > { %2988 = vmax.xlane.f32.xlu0 %v2987_v35 }
 0x2ce   : > { %v8127_v38 = vpop.f32.mrb[10].mxu1 }
 0x2cf   : > { %v6843_v39 = vpop.f32.mrb[11].mxu1  ;;  %v2984_v40 = vsel %vm523_vm2, %v8127_v38, -inf }
 0x2d0   : > { %2985 = vmax.xlane.f32.xlu1 %v2984_v40  ;;  %v8193_v40 = vpop.permute.xlu1 %4522 }
 0x2d1   : > { %8886 = vst [vmem:[#allocation9_spill] sm:$0xff] %v8193_v40 }
 0x2da   : > { %v8139_v45 = vpop.f32.mrb[20].mxu0 }
 0x2db   : > { %v6858_v46 = vpop.f32.mrb[21].mxu0  ;;  %v2993_v47 = vsel %vm523_vm2, %v8139_v45, -inf }
 0x2dc   : > { %2994 = vmax.xlane.f32.xlu0 %v2993_v47 }
 0x2de   : > { %v8145_v49 = vpop.f32.mrb[12].mxu1 }
 0x2df   : > { %v6853_v50 = vpop.f32.mrb[13].mxu1  ;;  %v2990_v51 = vsel %vm523_vm2, %v8145_v49, -inf }
 0x2e0   : > { %2991 = vmax.xlane.f32.xlu1 %v2990_v51 }
 0x2e2   : > { %v2956_v39 = vpop.xlane.xlu0 %2955 }
 0x2e3   : > { %v3050_v50 = vsub.f32 %v8073_v59, %v2956_v39  ;;  %v8210_v59 = vpop.permute.xlu1 %4674 }
 0x2e4   : > { %8887 = vst [vmem:[#allocation10_spill] sm:$0xff] %v8210_v59 }
 0x2ea   : > { %v8157_v56 = vpop.f32.mrb[22].mxu0 }
 0x2eb   : > { %v6868_v57 = vpop.f32.mrb[23].mxu0  ;;  %v2999_v58 = vsel %vm523_vm2, %v8157_v56, -inf }
 0x2ec   : > { %3000 = vmax.xlane.f32.xlu0 %v2999_v58 }
 0x2ee   : > { %v8165_v0 = vpop.f32.mrb[14].mxu1  ;;  %v8167_v1 = vpop.f32.mrb[24].mxu0 }
 0x2ef   : > { %v6863_v4 = vpop.f32.mrb[15].mxu1  ;;  %v2996_v6 = vsel %vm523_vm2, %v8165_v0, -inf  ;;  %v6878_v8 = vpop.f32.mrb[25].mxu0  ;;  %v3005_v9 = vsel %vm523_vm2, %v8167_v1, -inf }
 0x2f0   : > { %2997 = vmax.xlane.f32.xlu1 %v2996_v6  ;;  %3006 = vmax.xlane.f32.xlu0 %v3005_v9  ;;  %v3082_v8 = vmul.f32 1.442695, %v3050_v50 }
 0x2f2   : > { %v8175_v12 = vpop.f32.mrb[16].mxu1  ;;  %v8177_v14 = vpop.f32.mrb[26].mxu0  ;;  %7197 = vpow2.f32 %v3082_v8 }
 0x2f3   : > { %v6873_v15 = vpop.f32.mrb[17].mxu1  ;;  %v3002_v18 = vsel %vm523_vm2, %v8175_v12, -inf  ;;  %v6888_v22 = vpop.f32.mrb[27].mxu0  ;;  %v3011_v24 = vsel %vm523_vm2, %v8177_v14, -inf }
 0x2f4   : > { %3003 = vmax.xlane.f32.xlu1 %v3002_v18  ;;  %3012 = vmax.xlane.f32.xlu0 %v3011_v24 }
 0x2f6   : > { %v8185_v26 = vpop.f32.mrb[18].mxu1  ;;  %v8187_v27 = vpop.f32.mrb[28].mxu0 }
 0x2f7   : > { %v6883_v30 = vpop.f32.mrb[19].mxu1  ;;  %v6898_v31 = vpop.f32.mrb[29].mxu0  ;;  %v3008_v34 = vsel %vm523_vm2, %v8185_v26, -inf  ;;  %v3017_v35 = vsel %vm523_vm2, %v8187_v27, -inf }
 0x2f8   : > { %3009 = vmax.xlane.f32.xlu1 %v3008_v34  ;;  %3018 = vmax.xlane.f32.xlu0 %v3017_v35 }
 0x2fa   : > { %v8195_v46 = vpop.f32.mrb[20].mxu1  ;;  %v8197_v47 = vpop.f32.mrb[30].mxu0 }
 0x2fb   : > { %v6893_v51 = vpop.f32.mrb[21].mxu1  ;;  %v6908_v57 = vpop.f32.mrb[31].mxu0  ;;  %v3014_v58 = vsel %vm523_vm2, %v8195_v46, -inf  ;;  %v3023_v4 = vsel %vm523_vm2, %v8197_v47, -inf }
 0x2fc   : > { %3015 = vmax.xlane.f32.xlu1 %v3014_v58  ;;  %3024 = vmax.xlane.f32.xlu0 %v3023_v4  ;;  %v8222_v51 = vpop.permute.xlu1 %4826 }
 0x2fd   : > { %8888 = vst [vmem:[#allocation11_spill] sm:$0xff] %v8222_v51 }
 0x2fe   : > { %v8204_v6 = vpop.f32.mrb[32].mxu0 }
 0x2ff   : > { %v8206_v9 = vpop.f32.mrb[22].mxu1  ;;  %v6918_v15 = vpop.f32.mrb[33].mxu0  ;;  %v3029_v18 = vsel %vm523_vm2, %v8204_v6, -inf }
 0x300   : > { %v6903_v22 = vpop.f32.mrb[23].mxu1  ;;  %v3020_v24 = vsel %vm523_vm2, %v8206_v9, -inf  ;;  %3030 = vmax.xlane.f32.xlu0 %v3029_v18 }
 0x301   : > { %3021 = vmax.xlane.f32.xlu1 %v3020_v24 }
 0x302   : > { %v8214_v30 = vpop.f32.mrb[34].mxu0 }
 0x303   : > { %v8216_v31 = vpop.f32.mrb[24].mxu1  ;;  %v6928_v34 = vpop.f32.mrb[35].mxu0  ;;  %v3035_v35 = vsel %vm523_vm2, %v8214_v30, -inf }
 0x304   : > { %v6913_v39 = vpop.f32.mrb[25].mxu1  ;;  %v3026_v50 = vsel %vm523_vm2, %v8216_v31, -inf  ;;  %3036 = vmax.xlane.f32.xlu0 %v3035_v35 }
 0x305   : > { %3027 = vmax.xlane.f32.xlu1 %v3026_v50 }
 0x306   : > { %v8224_v57 = vpop.f32.mrb[36].mxu0 }
 0x307   : > { %v8226_v58 = vpop.f32.mrb[26].mxu1  ;;  %v6938_v4 = vpop.f32.mrb[37].mxu0  ;;  %v3041_v8 = vsel %vm523_vm2, %v8224_v57, -inf }
 0x308   : > { %v6923_v15 = vpop.f32.mrb[27].mxu1  ;;  %v3032_v18 = vsel %vm523_vm2, %v8226_v58, -inf  ;;  %3042 = vmax.xlane.f32.xlu0 %v3041_v8  ;;  %v8240_v4 = vpop.eup %7197 }
 0x309   : > { %3033 = vmax.xlane.f32.xlu1 %v3032_v18  ;;  %v8242_v15 = vpop.permute.xlu1 %4902  ;;  %v3146_v8 = vsel %vm523_vm2, %v8240_v4, 0.0 }
 0x30a   : > { %8889 = vst [vmem:[#allocation12_spill] sm:$0xff] %v8242_v15 }
 0x30b   : > { %v8232_v22 = vpop.f32.mrb[28].mxu1  ;;  %v8234_v24 = vpop.f32.mrb[38].mxu0 }
 0x30c   : > { %v6933_v34 = vpop.f32.mrb[29].mxu1  ;;  %v3038_v35 = vsel %vm523_vm2, %v8232_v22, -inf  ;;  %v6948_v39 = vpop.f32.mrb[39].mxu0  ;;  %v3047_v50 = vsel %vm523_vm2, %v8234_v24, -inf }
 0x30d   : > { %3039 = vmax.xlane.f32.xlu1 %v3038_v35  ;;  %3048 = vmax.xlane.f32.xlu0 %v3047_v50  ;;  %v8248_v34 = vpop.permute.xlu1 %4370 }
 0x310   : > { %v8244_v18 = vpop.f32.mrb[30].mxu1 }
 0x311   : > { %v6943_v21 = vpop.f32.mrb[31].mxu1  ;;  %3147 = vadd.xlane.f32.xlu1 %v3146_v8  ;;  %v3044_v39 = vsel %vm523_vm2, %v8244_v18, -inf  ;;  %v8252_v19 = vpop.permute.xlu1 %5054 }
 0x312   : > { %8890 = vst [vmem:[#allocation13_spill] sm:$0xff] %v8252_v19  ;;  %v2962_v21 = vpop.xlane.xlu0 %2961 }
 0x313   : > { %v3052_v19 = vsub.f32 %v8081_v3, %v2962_v21 }
 0x315   : > { %3045 = vmax.xlane.f32.xlu1 %v3044_v39  ;;  %v8254_v62 = vpop.permute.xlu1 %5206  ;;  %v3086_v53 = vmul.f32 1.442695, %v3052_v19 }
 0x316   : > { %8891 = vst [vmem:[#allocation14_spill] sm:$0xff] %v8254_v62  ;;  %v2965_v55 = vpop.xlane.xlu0 %2964 }
 0x317   : > { %v3053_v39 = vsub.f32 %v8085_v7, %v2965_v55 }
 0x319   : > { %v8258_v35 = vpop.permute.xlu1 %5358  ;;  %v3088_v62 = vmul.f32 1.442695, %v3053_v39 }
 0x31a   : > { %8892 = vst [vmem:[#allocation15_spill] sm:$0xff] %v8258_v35  ;;  %v2971_v15 = vpop.xlane.xlu0 %2970 }
 0x31d   : > { %v2959_v50 = vpop.xlane.xlu1 %2958 }
 0x31e   : > { %v3051_v8 = vsub.f32 %v8077_v63, %v2959_v50  ;;  %v2977_v35 = vpop.xlane.xlu0 %2976 }
 0x31f   : > { %v3057_v63 = vsub.f32 %v8097_v17, %v2977_v35 }
 0x320   : > { %v3084_v51 = vmul.f32 1.442695, %v3051_v8 }
 0x321   : > { %v2968_v59 = vpop.xlane.xlu1 %2967  ;;  %v3096_v7 = vmul.f32 1.442695, %v3057_v63 }
 0x322   : > { %7199 = vpow2.f32 %v3084_v51 }
 0x323   : > { %5434 = vrot.lane.b32.xlu0 %v7779_v2, %s7429_s13  ;;  %v3055_v2 = vsub.f32 %v8089_v10, %v2971_v15  ;;  %7201 = vpow2.f32 %v3088_v62 }
 0x324   : > { %7203 = vpow2.f32 %v3086_v53 }
 0x325   : > { %v3092_v40 = vmul.f32 1.442695, %v3055_v2  ;;  %v2974_v50 = vpop.xlane.xlu1 %2973 }
 0x326   : > { %5510 = vrot.lane.b32.xlu1 %v7759_v61, %s7429_s13  ;;  %v3054_v61 = vsub.f32 %v8093_v13, %v2968_v59  ;;  %v3056_v3 = vsub.f32 %v8101_v23, %v2974_v50 }
 0x327   : > { %7205 = vpow2.f32 %v3092_v40 }
 0x328   : > { %v3090_v8 = vmul.f32 1.442695, %v3054_v61  ;;  %v3094_v10 = vmul.f32 1.442695, %v3056_v3 }
 0x32a   : > { %7207 = vpow2.f32 %v3090_v8 }
 0x32b   : > { %7209 = vpow2.f32 %v3096_v7 }
 0x32c   : > { %v8269_v55 = vpop.eup %7199  ;;  %7211 = vpow2.f32 %v3094_v10 }
 0x32d   : > { %v3149_v13 = vsel %vm523_vm2, %v8269_v55, 0.0  ;;  %v8273_v62 = vpop.eup %7201 }
 0x32e   : > { %v8276_v19 = vpop.eup %7203  ;;  %v3155_v23 = vsel %vm523_vm2, %v8273_v62, 0.0 }
 0x32f   : > { %v3152_v15 = vsel %vm523_vm2, %v8276_v19, 0.0 }
 0x331   : > { %v8280_v40 = vpop.eup %7205 }
 0x334   : > { %v8282_v59 = vpop.eup %7207 }
 0x335   : > { %v8288_v21 = vpop.eup %7209  ;;  %v3158_v61 = vsel %vm523_vm2, %v8282_v59, 0.0 }
 0x336   : > { %v3167_v50 = vsel %vm523_vm2, %v8288_v21, 0.0  ;;  %v8295_v8 = vpop.eup %7211 }
 0x341   : > { %v2983_v51 = vpop.xlane.xlu0 %2982 }
 0x342   : > { %v3059_v17 = vsub.f32 %v8107_v25, %v2983_v51  ;;  %3150 = vadd.xlane.f32.xlu0 %v3149_v13  ;;  %v3161_v25 = vsel %vm523_vm2, %v8280_v40, 0.0 }
 0x344   : > { %v3100_v53 = vmul.f32 1.442695, %v3059_v17 }
 0x346   : > { %7213 = vpow2.f32 %v3100_v53  ;;  %3156 = vadd.xlane.f32.xlu0 %v3155_v23 }
 0x349   : > { %v2980_v35 = vpop.xlane.xlu1 %2979 }
 0x34a   : > { %3153 = vadd.xlane.f32.xlu1 %v3152_v15  ;;  %v3058_v39 = vsub.f32 %v8113_v29, %v2980_v35  ;;  %3162 = vadd.xlane.f32.xlu0 %v3161_v25  ;;  %v3164_v29 = vsel %vm523_vm2, %v8295_v8, 0.0 }
 0x34c   : > { %v3098_v2 = vmul.f32 1.442695, %v3058_v39 }
 0x34d   : > { %v2989_v63 = vpop.xlane.xlu0 %2988 }
 0x34e   : > { %7215 = vpow2.f32 %v3098_v2  ;;  %3159 = vadd.xlane.f32.xlu1 %v3158_v61  ;;  %v3061_v7 = vsub.f32 %v8119_v33, %v2989_v63  ;;  %3168 = vadd.xlane.f32.xlu0 %v3167_v50 }
 0x350   : > { %v8298_v3 = vpop.eup %7213  ;;  %v3104_v10 = vmul.f32 1.442695, %v3061_v7 }
 0x351   : > { %v3173_v51 = vsel %vm523_vm2, %v8298_v3, 0.0 }
 0x352   : > { %7217 = vpow2.f32 %v3104_v10  ;;  %3165 = vadd.xlane.f32.xlu1 %v3164_v29  ;;  %3174 = vadd.xlane.f32.xlu0 %v3173_v51 }
 0x358   : > { %v8304_v13 = vpop.eup %7215 }
 0x359   : > { %v3170_v17 = vsel %vm523_vm2, %v8304_v13, 0.0 }
 0x35a   : > { %3171 = vadd.xlane.f32.xlu1 %v3170_v17 }
 0x35c   : > { %v8308_v33 = vpop.eup %7217 }
 0x35d   : > { %v2986_v53 = vpop.xlane.xlu1 %2985  ;;  %v3179_v23 = vsel %vm523_vm2, %v8308_v33, 0.0 }
 0x35e   : > { %v3060_v15 = vsub.f32 %v8127_v38, %v2986_v53  ;;  %3180 = vadd.xlane.f32.xlu0 %v3179_v23 }
 0x360   : > { %v3102_v35 = vmul.f32 1.442695, %v3060_v15 }
 0x362   : > { %7219 = vpow2.f32 %v3102_v35 }
 0x369   : > { %v2995_v25 = vpop.xlane.xlu0 %2994 }
 0x36a   : > { %v3063_v39 = vsub.f32 %v8139_v45, %v2995_v25 }
 0x36c   : > { %v8314_v2 = vpop.eup %7219  ;;  %v3108_v61 = vmul.f32 1.442695, %v3063_v39 }
 0x36d   : > { %v2992_v63 = vpop.xlane.xlu1 %2991  ;;  %v3176_v50 = vsel %vm523_vm2, %v8314_v2, 0.0 }
 0x36e   : > { %7221 = vpow2.f32 %v3108_v61  ;;  %v3062_v7 = vsub.f32 %v8145_v49, %v2992_v63  ;;  %3177 = vadd.xlane.f32.xlu1 %v3176_v50 }
 0x370   : > { %v3106_v10 = vmul.f32 1.442695, %v3062_v7 }
 0x372   : > { %7223 = vpow2.f32 %v3106_v10 }
 0x378   : > { %v8319_v38 = vpop.eup %7221 }
 0x379   : > { %v3001_v29 = vpop.xlane.xlu0 %3000  ;;  %v3185_v51 = vsel %vm523_vm2, %v8319_v38, 0.0 }
 0x37a   : > { %v3065_v45 = vsub.f32 %v8157_v56, %v3001_v29  ;;  %3186 = vadd.xlane.f32.xlu0 %v3185_v51 }
 0x37c   : > { %v8324_v17 = vpop.eup %7223  ;;  %v3112_v53 = vmul.f32 1.442695, %v3065_v45 }
 0x37d   : > { %v2998_v23 = vpop.xlane.xlu1 %2997  ;;  %v3182_v15 = vsel %vm523_vm2, %v8324_v17, 0.0  ;;  %v3007_v35 = vpop.xlane.xlu0 %3006 }
 0x37e   : > { %7225 = vpow2.f32 %v3112_v53  ;;  %v3064_v49 = vsub.f32 %v8165_v0, %v2998_v23  ;;  %3183 = vadd.xlane.f32.xlu1 %v3182_v15  ;;  %v3067_v25 = vsub.f32 %v8167_v1, %v3007_v35 }
 0x380   : > { %v3110_v39 = vmul.f32 1.442695, %v3064_v49  ;;  %v3116_v61 = vmul.f32 1.442695, %v3067_v25 }
 0x381   : > { %v3004_v63 = vpop.xlane.xlu1 %3003  ;;  %v3013_v50 = vpop.xlane.xlu0 %3012 }
 0x382   : > { %7227 = vpow2.f32 %v3110_v39  ;;  %v3066_v56 = vsub.f32 %v8175_v12, %v3004_v63  ;;  %v3069_v7 = vsub.f32 %v8177_v14, %v3013_v50 }
 0x383   : > { %7229 = vpow2.f32 %v3116_v61 }
 0x384   : > { %v3114_v10 = vmul.f32 1.442695, %v3066_v56  ;;  %v3120_v29 = vmul.f32 1.442695, %v3069_v7 }
 0x385   : > { %v3010_v51 = vpop.xlane.xlu1 %3009  ;;  %v3019_v45 = vpop.xlane.xlu0 %3018 }
 0x386   : > { %7231 = vpow2.f32 %v3114_v10  ;;  %v3068_v0 = vsub.f32 %v8185_v26, %v3010_v51  ;;  %v3071_v1 = vsub.f32 %v8187_v27, %v3019_v45 }
 0x387   : > { %7233 = vpow2.f32 %v3120_v29 }
 0x388   : > { %v8334_v53 = vpop.eup %7225  ;;  %v3118_v23 = vmul.f32 1.442695, %v3068_v0  ;;  %v3124_v15 = vmul.f32 1.442695, %v3071_v1 }
 0x389   : > { %v3016_v49 = vpop.xlane.xlu1 %3015  ;;  %v3191_v12 = vsel %vm523_vm2, %v8334_v53, 0.0  ;;  %v3025_v35 = vpop.xlane.xlu0 %3024 }
 0x38a   : > { %7235 = vpow2.f32 %v3118_v23  ;;  %v3070_v14 = vsub.f32 %v8195_v46, %v3016_v49  ;;  %3192 = vadd.xlane.f32.xlu0 %v3191_v12  ;;  %v3073_v26 = vsub.f32 %v8197_v47, %v3025_v35 }
 0x38b   : > { %7237 = vpow2.f32 %v3124_v15 }
 0x38c   : > { %v8340_v25 = vpop.eup %7227  ;;  %v3122_v39 = vmul.f32 1.442695, %v3070_v14  ;;  %v3128_v61 = vmul.f32 1.442695, %v3073_v26 }
 0x38d   : > { %v8342_v27 = vpop.eup %7229  ;;  %v3188_v63 = vsel %vm523_vm2, %v8340_v25, 0.0  ;;  %v3031_v50 = vpop.xlane.xlu0 %3030 }
 0x38e   : > { %7239 = vpow2.f32 %v3122_v39  ;;  %v3022_v56 = vpop.xlane.xlu1 %3021  ;;  %3189 = vadd.xlane.f32.xlu1 %v3188_v63  ;;  %v3197_v46 = vsel %vm523_vm2, %v8342_v27, 0.0  ;;  %v3075_v47 = vsub.f32 %v8204_v6, %v3031_v50 }
 0x38f   : > { %7241 = vpow2.f32 %v3128_v61  ;;  %v3072_v7 = vsub.f32 %v8206_v9, %v3022_v56  ;;  %3198 = vadd.xlane.f32.xlu0 %v3197_v46 }
 0x390   : > { %v8350_v10 = vpop.eup %7231  ;;  %v3132_v0 = vmul.f32 1.442695, %v3075_v47 }
 0x391   : > { %v8352_v29 = vpop.eup %7233  ;;  %v3126_v51 = vmul.f32 1.442695, %v3072_v7  ;;  %v3194_v45 = vsel %vm523_vm2, %v8350_v10, 0.0  ;;  %v3037_v23 = vpop.xlane.xlu0 %3036 }
 0x392   : > { %v3028_v1 = vpop.xlane.xlu1 %3027  ;;  %3195 = vadd.xlane.f32.xlu1 %v3194_v45  ;;  %v3203_v15 = vsel %vm523_vm2, %v8352_v29, 0.0  ;;  %v3077_v6 = vsub.f32 %v8214_v30, %v3037_v23 }
 0x393   : > { %7243 = vpow2.f32 %v3126_v51  ;;  %v3074_v9 = vsub.f32 %v8216_v31, %v3028_v1  ;;  %3204 = vadd.xlane.f32.xlu0 %v3203_v15 }
 0x394   : > { %v8360_v49 = vpop.eup %7235  ;;  %7245 = vpow2.f32 %v3132_v0  ;;  %v3136_v35 = vmul.f32 1.442695, %v3077_v6 }
 0x395   : > { %v8362_v12 = vpop.eup %7237  ;;  %v3130_v14 = vmul.f32 1.442695, %v3074_v9  ;;  %v3200_v26 = vsel %vm523_vm2, %v8360_v49, 0.0  ;;  %v3043_v61 = vpop.xlane.xlu0 %3042 }
 0x396   : > { %v3034_v39 = vpop.xlane.xlu1 %3033  ;;  %3201 = vadd.xlane.f32.xlu1 %v3200_v26  ;;  %v3209_v63 = vsel %vm523_vm2, %v8362_v12, 0.0  ;;  %v3079_v31 = vsub.f32 %v8224_v57, %v3043_v61 }
 0x397   : > { %7247 = vpow2.f32 %v3130_v14  ;;  %v3076_v30 = vsub.f32 %v8226_v58, %v3034_v39  ;;  %3210 = vadd.xlane.f32.xlu0 %v3209_v63 }
 0x398   : > { %v8370_v56 = vpop.eup %7239  ;;  %7249 = vpow2.f32 %v3136_v35  ;;  %v3140_v7 = vmul.f32 1.442695, %v3079_v31 }
 0x399   : > { %v8372_v50 = vpop.eup %7241  ;;  %v3134_v46 = vmul.f32 1.442695, %v3076_v30  ;;  %v3206_v47 = vsel %vm523_vm2, %v8370_v56, 0.0 }
 0x39a   : > { %v3040_v51 = vpop.xlane.xlu1 %3039  ;;  %3207 = vadd.xlane.f32.xlu1 %v3206_v47  ;;  %v3215_v0 = vsel %vm523_vm2, %v8372_v50, 0.0  ;;  %v3049_v45 = vpop.xlane.xlu0 %3048 }
 0x39b   : > { %7251 = vpow2.f32 %v3134_v46  ;;  %v3078_v57 = vsub.f32 %v8232_v22, %v3040_v51  ;;  %3216 = vadd.xlane.f32.xlu0 %v3215_v0  ;;  %v3081_v58 = vsub.f32 %v8234_v24, %v3049_v45 }
 0x39c   : > { %7253 = vpow2.f32 %v3140_v7 }
 0x39d   : > { %v8380_v1 = vpop.eup %7243  ;;  %v3138_v23 = vmul.f32 1.442695, %v3078_v57  ;;  %v3144_v15 = vmul.f32 1.442695, %v3081_v58 }
 0x39e   : > { %v8382_v9 = vpop.eup %7245  ;;  %v3148_v6 = vpop.xlane.xlu1 %3147  ;;  %v3212_v14 = vsel %vm523_vm2, %v8380_v1, 0.0 }
 0x39f   : > { %7255 = vpow2.f32 %v3138_v23  ;;  %3213 = vadd.xlane.f32.xlu1 %v3212_v14  ;;  %v3221_v35 = vsel %vm523_vm2, %v8382_v9, 0.0  ;;  %v8893_v23 = vmov 0.0  }
 0x3a0   : > { %7257 = vpow2.f32 %v3144_v15  ;;  %3222 = vadd.xlane.f32.xlu0 %v3221_v35 }
 0x3a1   : > { %v8388_v22 = vpop.eup %7247  ;;  %7259 = vrcp.f32 %v3148_v6 }
 0x3a2   : > { %v8390_v24 = vpop.eup %7249  ;;  %v3046_v26 = vpop.xlane.xlu1 %3045  ;;  %v3218_v39 = vsel %vm523_vm2, %v8388_v22, 0.0 }
 0x3a3   : > { %v3080_v61 = vsub.f32 %v8244_v18, %v3046_v26  ;;  %3219 = vadd.xlane.f32.xlu1 %v3218_v39  ;;  %v3227_v63 = vsel %vm523_vm2, %v8390_v24, 0.0 }
 0x3a4   : > { %3228 = vadd.xlane.f32.xlu0 %v3227_v63 }
 0x3a5   : > { %v8397_v30 = vpop.eup %7251  ;;  %v3142_v31 = vmul.f32 1.442695, %v3080_v61 }
 0x3a6   : > { %v8399_v46 = vpop.eup %7253  ;;  %v3224_v7 = vsel %vm523_vm2, %v8397_v30, 0.0  ;;  %v8429_v14 = vpop.permute.xlu1 %5510 }
 0x3a7   : > { %7261 = vpow2.f32 %v3142_v31  ;;  %3225 = vadd.xlane.f32.xlu1 %v3224_v7  ;;  %v3233_v47 = vsel %vm523_vm2, %v8399_v46, 0.0 }
 0x3a8   : > { %3234 = vadd.xlane.f32.xlu0 %v3233_v47 }
 0x3a9   : > { %v8405_v18 = vpop.eup %7255 }
 0x3aa   : > { %v8407_v51 = vpop.eup %7257  ;;  %v3230_v0 = vsel %vm523_vm2, %v8405_v18, 0.0 }
 0x3ab   : > { %v7260_v45 = vpop.eup %7259  ;;  %3231 = vadd.xlane.f32.xlu1 %v3230_v0  ;;  %v3239_v57 = vsel %vm523_vm2, %v8407_v51, 0.0 }
 0x3ac   : > { %v3274_v58 = vmul.f32 %v7260_v45, %v8240_v4  ;;  %3240 = vadd.xlane.f32.xlu0 %v3239_v57  ;;  %v8427_v4 = vpop.permute.xlu0 %5434 }
 0x3ae   : > { %6952 = vmatmul.mubr.msk.f32.vlgmr.msra.gmra.mrb[32].mxu1 %vm523_vm2, %v3274_v58 }
 0x3af   : > { %6960 = vmatpush3.msra.mxu1 %v8133_v42  ;;  %6961 = vmatprep.mubr.msk.f32.mxu1 %vm7428_vm1, %v8893_v23 }
 0x3b0   : > { %6969 = vmatprep.subr.mxu1 %v8893_v23 }
 0x3b1   : > { %v8419_v15 = vpop.eup %7261 }
 0x3b2   : > { %v3236_v6 = vsel %vm523_vm2, %v8419_v15, 0.0 }
 0x3b3   : > { %3237 = vadd.xlane.f32.xlu1 %v3236_v6 }
 0x3c2   : > { %5586 = vrot.lane.b32.xlu0 %v7863_v20, %s7429_s13 }
 0x3c4   : > { %5662 = vrot.lane.b32.xlu1 %v7791_v5, %s7429_s13 }
 0x3cf   : > { %v3151_v42 = vpop.xlane.xlu0 %3150 }
 0x3d0   : > { %7263 = vrcp.f32 %v3151_v42 }
 0x3d3   : > { %v3157_v35 = vpop.xlane.xlu0 %3156 }
 0x3d4   : > { %7265 = vrcp.f32 %v3157_v35 }
 0x3d7   : > { %v3154_v26 = vpop.xlane.xlu1 %3153  ;;  %v3163_v39 = vpop.xlane.xlu0 %3162 }
 0x3d8   : > { %7267 = vrcp.f32 %v3154_v26 }
 0x3d9   : > { %7269 = vrcp.f32 %v3163_v39 }
 0x3da   : > { %v7264_v61 = vpop.eup %7263 }
 0x3db   : > { %v3275_v63 = vmul.f32 %v7264_v61, %v8269_v55  ;;  %v3160_v31 = vpop.xlane.xlu1 %3159  ;;  %v3169_v20 = vpop.xlane.xlu0 %3168 }
 0x3dc   : > { %7271 = vrcp.f32 %v3160_v31 }
 0x3dd   : > { %7273 = vrcp.f32 %v3169_v20  ;;  %6957 = vmatmul.mubr.msk.f32.vlgmr.msra.gmra.mrb[40].mxu0 %vm523_vm2, %v3275_v63 }
 0x3de   : > { %v7266_v5 = vpop.eup %7265  ;;  %6965 = vmatpush3.msra.mxu0 %v8105_v16  ;;  %6966 = vmatprep.mubr.msk.f32.mxu0 %vm7428_vm1, %v8893_v23 }
 0x3df   : > { %v3277_v7 = vmul.f32 %v7266_v5, %v8273_v62  ;;  %v3166_v47 = vpop.xlane.xlu1 %3165  ;;  %v3175_v0 = vpop.xlane.xlu0 %3174  ;;  %6974 = vmatprep.subr.mxu0 %v8893_v23 }
 0x3e0   : > { %7275 = vrcp.f32 %v3166_v47 }
 0x3e1   : > { %7277 = vrcp.f32 %v3175_v0  ;;  %6967 = vmatmul.mubr.msk.f32.vlgmr.msra.gmra.mrb[42].mxu0 %vm523_vm2, %v3277_v7 }
 0x3e2   : > { %v7268_v55 = vpop.eup %7267  ;;  %6975 = vmatpush3.msra.mxu0 %v8111_v28  ;;  %6976 = vmatprep.mubr.msk.f32.mxu0 %vm7428_vm1, %v8893_v23 }
 0x3e3   : > { %v7270_v16 = vpop.eup %7269  ;;  %v3276_v45 = vmul.f32 %v7268_v55, %v8276_v19  ;;  %6984 = vmatprep.subr.mxu0 %v8893_v23  ;;  %v8894_v55 = vld [vmem:[#allocation9_spill] sm:$0xff] }
 0x3e4   : > { %v3279_v62 = vmul.f32 %v7270_v16, %v8280_v40 }
 0x3e5   : > { %6962 = vmatmul.mubr.msk.f32.vlgmr.msra.gmra.mrb[34].mxu1 %vm523_vm2, %v3276_v45  ;;  %v8895_v45 = vld [vmem:[#allocation5_spill] sm:$0xff] }
 0x3e6   : > { %v7272_v57 = vpop.eup %7271  ;;  %6970 = vmatpush3.msra.mxu1 %v8137_v44  ;;  %6977 = vmatmul.mubr.msk.f32.vlgmr.msra.gmra.mrb[44].mxu0 %vm523_vm2, %v3279_v62 }
 0x3e7   : > { %v7274_v58 = vpop.eup %7273  ;;  %v3278_v28 = vmul.f32 %v7272_v57, %v8282_v59  ;;  %6985 = vmatpush3.msra.mxu0 %v8117_v32  ;;  %6971 = vmatprep.mubr.msk.f32.mxu1 %vm7428_vm1, %v8893_v23  ;;  %v3172_v19 = vpop.xlane.xlu1 %3171  ;;  %v8896_v57 = vld [vmem:[#allocation10_spill] sm:$0xff] }
 0x3e8   : > { %v3281_v6 = vmul.f32 %v7274_v58, %v8288_v21  ;;  %6979 = vmatprep.subr.mxu1 %v8893_v23  ;;  %7279 = vrcp.f32 %v3172_v19  ;;  %6986 = vmatprep.mubr.msk.f32.mxu0 %vm7428_vm1, %v8893_v23 }
 0x3e9   : > { %6972 = vmatmul.mubr.msk.f32.vlgmr.msra.gmra.mrb[36].mxu1 %vm523_vm2, %v3278_v28  ;;  %6994 = vmatprep.subr.mxu0 %v8893_v23  ;;  %v8897_v28 = vld [vmem:[#allocation12_spill] sm:$0xff] }
 0x3ea   : > { %v7276_v44 = vpop.eup %7275  ;;  %6980 = vmatpush3.msra.mxu1 %v8149_v52  ;;  %6987 = vmatmul.mubr.msk.f32.vlgmr.msra.gmra.mrb[46].mxu0 %vm523_vm2, %v3281_v6 }
 0x3eb   : > { %v7278_v32 = vpop.eup %7277  ;;  %v3280_v40 = vmul.f32 %v7276_v44, %v8295_v8  ;;  %6995 = vmatpush3.msra.mxu0 %v8123_v36  ;;  %6981 = vmatprep.mubr.msk.f32.mxu1 %vm7428_vm1, %v8893_v23  ;;  %v3181_v59 = vpop.xlane.xlu0 %3180 }
 0x3ec   : > { %v3283_v21 = vmul.f32 %v7278_v32, %v8298_v3  ;;  %6989 = vmatprep.subr.mxu1 %v8893_v23  ;;  %7281 = vrcp.f32 %v3181_v59  ;;  %6996 = vmatprep.mubr.msk.f32.mxu0 %vm7428_vm1, %v8893_v23  ;;  %v8898_v32 = vld [vmem:[#allocation11_spill] sm:$0xff]  ;;  %v8899_v59 = vld [vmem:[#allocation13_spill] sm:$0xff] }
 0x3ed   : > { %6982 = vmatmul.mubr.msk.f32.vlgmr.msra.gmra.mrb[38].mxu1 %vm523_vm2, %v3280_v40  ;;  %7004 = vmatprep.subr.mxu0 %v8893_v23 }
 0x3ee   : > { %6990 = vmatpush3.msra.mxu1 %v8153_v54  ;;  %6997 = vmatmul.mubr.msk.f32.vlgmr.msra.gmra.mrb[48].mxu0 %vm523_vm2, %v3283_v21 }
 0x3ef   : > { %7005 = vmatpush3.msra.mxu0 %v8125_v37  ;;  %6991 = vmatprep.mubr.msk.f32.mxu1 %vm7428_vm1, %v8893_v23 }
 0x3f0   : > { %6999 = vmatprep.subr.mxu1 %v8893_v23  ;;  %7006 = vmatprep.mubr.msk.f32.mxu0 %vm7428_vm1, %v8893_v23 }
 0x3f1   : > { %7014 = vmatprep.subr.mxu0 %v8893_v23 }
 0x3f2   : > { %v7280_v36 = vpop.eup %7279 }
 0x3f3   : > { %v3282_v52 = vmul.f32 %v7280_v36, %v8304_v13 }
 0x3f5   : > { %6992 = vmatmul.mubr.msk.f32.vlgmr.msra.gmra.mrb[40].mxu1 %vm523_vm2, %v3282_v52 }
 0x3f6   : > { %v7282_v54 = vpop.eup %7281  ;;  %7000 = vmatpush3.msra.mxu1 %v8161_v60  ;;  %7001 = vmatprep.mubr.msk.f32.mxu1 %vm7428_vm1, %v8893_v23 }
 0x3f7   : > { %v3285_v37 = vmul.f32 %v7282_v54, %v8308_v33  ;;  %7009 = vmatprep.subr.mxu1 %v8893_v23 }
 0x3f9   : > { %7007 = vmatmul.mubr.msk.f32.vlgmr.msra.gmra.mrb[50].mxu0 %vm523_vm2, %v3285_v37  ;;  %v8901_v37 = vld [vmem:[#allocation14_spill] sm:$0xff] }
 0x3fa   : > { %7015 = vmatpush3.msra.mxu0 %v8131_v41  ;;  %7016 = vmatprep.mubr.msk.f32.mxu0 %vm7428_vm1, %v8893_v23 }
 0x3fb   : > { %v3178_v8 = vpop.xlane.xlu1 %3177  ;;  %7024 = vmatprep.subr.mxu0 %v8893_v23 }
 0x3fc   : > { %7283 = vrcp.f32 %v3178_v8 }
 0x406   : > { %v7284_v3 = vpop.eup %7283 }
 0x407   : > { %v3284_v60 = vmul.f32 %v7284_v3, %v8314_v2  ;;  %v3187_v13 = vpop.xlane.xlu0 %3186 }
 0x408   : > { %7285 = vrcp.f32 %v3187_v13 }
 0x409   : > { %7002 = vmatmul.mubr.msk.f32.vlgmr.msra.gmra.mrb[42].mxu1 %vm523_vm2, %v3284_v60 }
 0x40a   : > { %7010 = vmatpush3.msra.mxu1 %v8173_v11  ;;  %7011 = vmatprep.mubr.msk.f32.mxu1 %vm7428_vm1, %v8893_v23 }
 0x40b   : > { %v3184_v41 = vpop.xlane.xlu1 %3183  ;;  %7019 = vmatprep.subr.mxu1 %v8893_v23 }
 0x40c   : > { %7287 = vrcp.f32 %v3184_v41 }
 0x412   : > { %v7286_v33 = vpop.eup %7285 }
 0x413   : > { %v3287_v42 = vmul.f32 %v7286_v33, %v8319_v38  ;;  %v8902_v33 = vld [vmem:[#allocation7_spill] sm:$0xff] }
 0x415   : > { %7017 = vmatmul.mubr.msk.f32.vlgmr.msra.gmra.mrb[52].mxu0 %vm523_vm2, %v3287_v42 }
 0x416   : > { %v7288_v35 = vpop.eup %7287  ;;  %7025 = vmatpush3.msra.mxu0 %v8135_v43  ;;  %7026 = vmatprep.mubr.msk.f32.mxu0 %vm7428_vm1, %v8893_v23 }
 0x417   : > { %v3286_v11 = vmul.f32 %v7288_v35, %v8324_v17  ;;  %v3193_v2 = vpop.xlane.xlu0 %3192  ;;  %7034 = vmatprep.subr.mxu0 %v8893_v23  ;;  %v8903_v35 = vld [vmem:[#allocation15_spill] sm:$0xff] }
 0x418   : > { %7289 = vrcp.f32 %v3193_v2  ;;  %v8904_v2 = vld [vmem:[#allocation8_spill] sm:$0xff] }
 0x419   : > { %7012 = vmatmul.mubr.msk.f32.vlgmr.msra.gmra.mrb[44].mxu1 %vm523_vm2, %v3286_v11 }
 0x41a   : > { %7020 = vmatpush3.msra.mxu1 %v8248_v34  ;;  %7021 = vmatprep.mubr.msk.f32.mxu1 %vm7428_vm1, %v8893_v23 }
 0x41b   : > { %v3190_v38 = vpop.xlane.xlu1 %3189  ;;  %7029 = vmatprep.subr.mxu1 %v8893_v23 }
 0x41c   : > { %7291 = vrcp.f32 %v3190_v38  ;;  %v3199_v43 = vpop.xlane.xlu0 %3198 }
 0x41d   : > { %7293 = vrcp.f32 %v3199_v43 }
 0x41f   : > { %v3196_v26 = vpop.xlane.xlu1 %3195 }
 0x420   : > { %7295 = vrcp.f32 %v3196_v26  ;;  %v3205_v17 = vpop.xlane.xlu0 %3204 }
 0x421   : > { %7297 = vrcp.f32 %v3205_v17 }
 0x422   : > { %v7290_v39 = vpop.eup %7289 }
 0x423   : > { %v3289_v61 = vmul.f32 %v7290_v39, %v8334_v53  ;;  %v3202_v63 = vpop.xlane.xlu1 %3201 }
 0x424   : > { %7299 = vrcp.f32 %v3202_v63  ;;  %v3211_v31 = vpop.xlane.xlu0 %3210 }
 0x425   : > { %7301 = vrcp.f32 %v3211_v31  ;;  %7027 = vmatmul.mubr.msk.f32.vlgmr.msra.gmra.mrb[54].mxu0 %vm523_vm2, %v3289_v61 }
 0x426   : > { %v7292_v34 = vpop.eup %7291  ;;  %7035 = vmatpush3.msra.mxu0 %v8143_v48  ;;  %7036 = vmatprep.mubr.msk.f32.mxu0 %vm7428_vm1, %v8893_v23 }
 0x427   : > { %v7294_v20 = vpop.eup %7293  ;;  %v3288_v5 = vmul.f32 %v7292_v34, %v8340_v25  ;;  %v3208_v7 = vpop.xlane.xlu1 %3207  ;;  %7044 = vmatprep.subr.mxu0 %v8893_v23 }
 0x428   : > { %v3291_v53 = vmul.f32 %v7294_v20, %v8342_v27  ;;  %7303 = vrcp.f32 %v3208_v7  ;;  %v3217_v47 = vpop.xlane.xlu0 %3216 }
 0x429   : > { %7305 = vrcp.f32 %v3217_v47  ;;  %7022 = vmatmul.mubr.msk.f32.vlgmr.msra.gmra.mrb[46].mxu1 %vm523_vm2, %v3288_v5 }
 0x42a   : > { %v7296_v0 = vpop.eup %7295  ;;  %7030 = vmatpush3.msra.mxu1 %v8894_v55  ;;  %7037 = vmatmul.mubr.msk.f32.vlgmr.msra.gmra.mrb[56].mxu0 %vm523_vm2, %v3291_v53 }
 0x42b   : > { %v7298_v48 = vpop.eup %7297  ;;  %v3290_v16 = vmul.f32 %v7296_v0, %v8350_v10  ;;  %7045 = vmatpush3.msra.mxu0 %v8895_v45  ;;  %7031 = vmatprep.mubr.msk.f32.mxu1 %vm7428_vm1, %v8893_v23 }
 0x42c   : > { %v3293_v25 = vmul.f32 %v7298_v48, %v8352_v29  ;;  %v3214_v27 = vpop.xlane.xlu1 %3213  ;;  %7039 = vmatprep.subr.mxu1 %v8893_v23  ;;  %7046 = vmatprep.mubr.msk.f32.mxu0 %vm7428_vm1, %v8893_v23 }
 0x42d   : > { %7307 = vrcp.f32 %v3214_v27  ;;  %v3223_v62 = vpop.xlane.xlu0 %3222  ;;  %7054 = vmatprep.subr.mxu0 %v8893_v23  ;;  %7032 = vmatmul.mubr.msk.f32.vlgmr.msra.gmra.mrb[48].mxu1 %vm523_vm2, %v3290_v16 }
 0x42e   : > { %v7300_v10 = vpop.eup %7299  ;;  %7309 = vrcp.f32 %v3223_v62  ;;  %7040 = vmatpush3.msra.mxu1 %v8896_v57  ;;  %7047 = vmatmul.mubr.msk.f32.vlgmr.msra.gmra.mrb[58].mxu0 %vm523_vm2, %v3293_v25 }
 0x42f   : > { %v7302_v58 = vpop.eup %7301  ;;  %v3292_v29 = vmul.f32 %v7300_v10, %v8360_v49  ;;  %7055 = vmatpush3.msra.mxu0 %v8897_v28  ;;  %7041 = vmatprep.mubr.msk.f32.mxu1 %vm7428_vm1, %v8893_v23 }
 0x430   : > { %v3295_v19 = vmul.f32 %v7302_v58, %v8362_v12  ;;  %v3220_v6 = vpop.xlane.xlu1 %3219  ;;  %7049 = vmatprep.subr.mxu1 %v8893_v23  ;;  %7056 = vmatprep.mubr.msk.f32.mxu0 %vm7428_vm1, %v8893_v23 }
 0x431   : > { %7311 = vrcp.f32 %v3220_v6  ;;  %v3229_v44 = vpop.xlane.xlu0 %3228  ;;  %7064 = vmatprep.subr.mxu0 %v8893_v23  ;;  %7042 = vmatmul.mubr.msk.f32.vlgmr.msra.gmra.mrb[50].mxu1 %vm523_vm2, %v3292_v29 }
 0x432   : > { %v7304_v49 = vpop.eup %7303  ;;  %7313 = vrcp.f32 %v3229_v44  ;;  %7050 = vmatpush3.msra.mxu1 %v8898_v32  ;;  %7057 = vmatmul.mubr.msk.f32.vlgmr.msra.gmra.mrb[60].mxu0 %vm523_vm2, %v3295_v19 }
 0x433   : > { %v7306_v40 = vpop.eup %7305  ;;  %v3294_v12 = vmul.f32 %v7304_v49, %v8370_v56  ;;  %7065 = vmatpush3.msra.mxu0 %v8899_v59  ;;  %7051 = vmatprep.mubr.msk.f32.mxu1 %vm7428_vm1, %v8893_v23  ;;  %v8900_v56 = vld [vmem:[#allocation6_spill] sm:$0xff] }
 0x434   : > { %v3297_v21 = vmul.f32 %v7306_v40, %v8372_v50  ;;  %v3226_v36 = vpop.xlane.xlu1 %3225  ;;  %7059 = vmatprep.subr.mxu1 %v8893_v23  ;;  %7066 = vmatprep.mubr.msk.f32.mxu0 %vm7428_vm1, %v8893_v23 }
 0x435   : > { %7315 = vrcp.f32 %v3226_v36  ;;  %v3235_v52 = vpop.xlane.xlu0 %3234  ;;  %7074 = vmatprep.subr.mxu0 %v8893_v23  ;;  %7052 = vmatmul.mubr.msk.f32.vlgmr.msra.gmra.mrb[52].mxu1 %vm523_vm2, %v3294_v12  ;;  %v5861_v36 = vld [vmem:[%s8874_s3 + $0x8] sm:$0xff] }
 0x436   : > { %7317 = vrcp.f32 %v3235_v52  ;;  %7060 = vmatpush3.msra.mxu1 %v8900_v56  ;;  %7067 = vmatmul.mubr.msk.f32.vlgmr.msra.gmra.mrb[62].mxu0 %vm523_vm2, %v3297_v21  ;;  %v5860_v21 = vld [vmem:[%s8874_s3] sm:$0xff] }
 0x437   : > { %v7308_v54 = vpop.eup %7307  ;;  %7075 = vmatpush3.msra.mxu0 %v8901_v37  ;;  %7061 = vmatprep.mubr.msk.f32.mxu1 %vm7428_vm1, %v8893_v23  ;;  %v7137_v56 = vpack.c.bf16 %v5861_v36, %v5860_v21 }
 0x438   : > { %v7310_v50 = vpop.eup %7309  ;;  %v3296_v8 = vmul.f32 %v7308_v54, %v8380_v1  ;;  %v3232_v3 = vpop.xlane.xlu1 %3231  ;;  %7069 = vmatprep.subr.mxu1 %v8893_v23  ;;  %7076 = vmatprep.mubr.msk.f32.mxu0 %vm7428_vm1, %v8893_v23 }
 0x439   : > { %v3299_v60 = vmul.f32 %v7310_v50, %v8382_v9  ;;  %7319 = vrcp.f32 %v3232_v3  ;;  %7084 = vmatprep.subr.mxu0 %v8893_v23  ;;  %v3241_v13 = vpop.xlane.xlu0 %3240  ;;  %v5862_v3 = vld [vmem:[%s8874_s3 + $0x10] sm:$0xff] }
 0x43a   : > { %7321 = vrcp.f32 %v3241_v13  ;;  %7062 = vmatmul.mubr.msk.f32.vlgmr.msra.gmra.mrb[54].mxu1 %vm523_vm2, %v3296_v8 }
 0x43b   : > { %v7312_v41 = vpop.eup %7311  ;;  %7070 = vmatpush3.msra.mxu1 %v8902_v33  ;;  %7077 = vmatmul.mubr.msk.f32.vlgmr.msra.gmra.mrb[64].mxu0 %vm523_vm2, %v3299_v60  ;;  %v5863_v60 = vld [vmem:[%s8874_s3 + $0x18] sm:$0xff] }
 0x43c   : > { %v7314_v1 = vpop.eup %7313  ;;  %v3298_v42 = vmul.f32 %v7312_v41, %v8388_v22  ;;  %7085 = vmatpush3.msra.mxu0 %v8903_v35  ;;  %7071 = vmatprep.mubr.msk.f32.mxu1 %vm7428_vm1, %v8893_v23  ;;  %v7141_v13 = vpack.c.bf16 %v5863_v60, %v5862_v3 }
 0x43d   : > { %v3301_v9 = vmul.f32 %v7314_v1, %v8390_v24  ;;  %7079 = vmatprep.subr.mxu1 %v8893_v23  ;;  %7086 = vmatprep.mubr.msk.f32.mxu0 %vm7428_vm1, %v8893_v23  ;;  %v5587_v39 = vpop.permute.xlu0 %5586 }
 0x43e   : > { %7094 = vmatprep.subr.mxu0 %v8893_v23  ;;  %7072 = vmatmul.mubr.msk.f32.vlgmr.msra.gmra.mrb[56].mxu1 %vm523_vm2, %v3298_v42 }
 0x43f   : > { %v7316_v11 = vpop.eup %7315  ;;  %7080 = vmatpush3.msra.mxu1 %v8904_v2  ;;  %7087 = vmatmul.mubr.msk.f32.vlgmr.msra.gmra.mrb[66].mxu0 %vm523_vm2, %v3301_v9 }
 0x440   : > { %v7318_v22 = vpop.eup %7317  ;;  %v3300_v38 = vmul.f32 %v7316_v11, %v8397_v30  ;;  %7095 = vmatpush3.msra.mxu0 %v8429_v14  ;;  %v3238_v24 = vpop.xlane.xlu1 %3237  ;;  %7081 = vmatprep.mubr.msk.f32.mxu1 %vm7428_vm1, %v8893_v23 }
 0x441   : > { %v3303_v43 = vmul.f32 %v7318_v22, %v8399_v46  ;;  %7323 = vrcp.f32 %v3238_v24  ;;  %7089 = vmatprep.subr.mxu1 %v8893_v23  ;;  %7096 = vmatprep.mubr.msk.f32.mxu0 %vm7428_vm1, %v8893_v23 }
 0x442   : > { %7082 = vmatmul.mubr.msk.f32.vlgmr.msra.gmra.mrb[58].mxu1 %vm523_vm2, %v3300_v38  ;;  %7104 = vmatprep.subr.mxu0 %v8893_v23 }
 0x443   : > { %v7320_v26 = vpop.eup %7319  ;;  %7090 = vmatpush3.msra.mxu1 %v8427_v4  ;;  %7097 = vmatmul.mubr.msk.f32.vlgmr.msra.gmra.mrb[68].mxu0 %vm523_vm2, %v3303_v43 }
 0x444   : > { %v7322_v30 = vpop.eup %7321  ;;  %v3302_v14 = vmul.f32 %v7320_v26, %v8405_v18  ;;  %v5663_v17 = vpop.permute.xlu1 %5662  ;;  %7091 = vmatprep.mubr.msk.f32.mxu1 %vm7428_vm1, %v8893_v23  ;;  %7099 = vmatprep.subr.mxu1 %v8893_v23 }
 0x445   : > { %v3305_v46 = vmul.f32 %v7322_v30, %v8407_v51  ;;  %7105 = vmatpush3.msra.mxu0 %v5663_v17  ;;  %7106 = vmatprep.mubr.msk.f32.mxu0 %vm7428_vm1, %v8893_v23 }
 0x446   : > { %7092 = vmatmul.mubr.msk.f32.vlgmr.msra.gmra.mrb[60].mxu1 %vm523_vm2, %v3302_v14 }
 0x447   : > { %7100 = vmatpush3.msra.mxu1 %v5587_v39  ;;  %7107 = vmatmul.mubr.msk.f32.vlgmr.msra.gmra.mrb[70].mxu0 %vm523_vm2, %v3305_v46 }
 0x448   : > { %7101 = vmatprep.mubr.msk.f32.mxu1 %vm7428_vm1, %v8893_v23  ;;  %7138 = vmatprep.subr.bf16.mxu1 %v7137_v56 }
 0x44b   : > { %v7324_v18 = vpop.eup %7323 }
 0x44c   : > { %v3304_v4 = vmul.f32 %v7324_v18, %v8419_v15 }
 0x44e   : > { %7102 = vmatmul.mubr.msk.f32.vlgmr.msra.gmra.mrb[62].mxu1 %vm523_vm2, %v3304_v4 }
 0x44f   : > { %7140 = vmatpush3.bf16.msra.mxu1 %v7137_v56 }
 0x450   : > { %7142 = vmatprep.subr.bf16.mxu1 %v7141_v13 }
 0x453   : > { %7144 = vmatpush3.bf16.msra.mxu1 %v7141_v13 }
 0x481   : > { %v8605_v61 = vpop.f32.mrb[32].mxu1 }
 0x482   : > { %v6953_v51 = vpop.f32.mrb[33].mxu1 }
 0x4b0   : > { %v8607_v63 = vpop.f32.mrb[40].mxu0 }
 0x4b1   : > { %v6958_v31 = vpop.f32.mrb[41].mxu0 }
 0x4b4   : > { %v8609_v34 = vpop.f32.mrb[42].mxu0 }
 0x4b5   : > { %v6968_v20 = vpop.f32.mrb[43].mxu0 }
 0x4b8   : > { %v8611_v5 = vpop.f32.mrb[34].mxu1 }
 0x4b9   : > { %v6963_v7 = vpop.f32.mrb[35].mxu1  ;;  %v8613_v53 = vpop.f32.mrb[44].mxu0 }
 0x4ba   : > { %v6978_v23 = vpop.f32.mrb[45].mxu0 }
 0x4bc   : > { %v8615_v47 = vpop.f32.mrb[36].mxu1 }
 0x4bd   : > { %v6973_v15 = vpop.f32.mrb[37].mxu1  ;;  %v8617_v0 = vpop.f32.mrb[46].mxu0 }
 0x4be   : > { %v6988_v55 = vpop.f32.mrb[47].mxu0 }
 0x4c0   : > { %v8619_v48 = vpop.f32.mrb[38].mxu1 }
 0x4c1   : > { %v6983_v16 = vpop.f32.mrb[39].mxu1  ;;  %v4062_v45 = vpop.f32.mrb[48].mxu0 }
 0x4c2   : > { %5748 = vrot.lane.b32.xlu1 %v4062_v45, %s7430_s14  ;;  %v6998_v25 = vpop.f32.mrb[49].mxu0 }
 0x4c8   : > { %v3986_v27 = vpop.f32.mrb[40].mxu1 }
 0x4c9   : > { %v6993_v62 = vpop.f32.mrb[41].mxu1  ;;  %5746 = vrot.lane.b32.xlu0 %v3986_v27, %s7430_s14 }
 0x4cc   : > { %v4214_v10 = vpop.f32.mrb[50].mxu0 }
 0x4cd   : > { %5752 = vrot.lane.b32.xlu1 %v4214_v10, %s7430_s14  ;;  %v7008_v57 = vpop.f32.mrb[51].mxu0 }
 0x4dc   : > { %v4138_v58 = vpop.f32.mrb[42].mxu1 }
 0x4dd   : > { %v7003_v29 = vpop.f32.mrb[43].mxu1  ;;  %5750 = vrot.lane.b32.xlu0 %v4138_v58, %s7430_s14 }
 0x4e8   : > { %v4366_v28 = vpop.f32.mrb[52].mxu0 }
 0x4e9   : > { %5756 = vrot.lane.b32.xlu1 %v4366_v28, %s7430_s14  ;;  %v7018_v19 = vpop.f32.mrb[53].mxu0 }
 0x4ec   : > { %v4290_v6 = vpop.f32.mrb[44].mxu1 }
 0x4ed   : > { %v7013_v44 = vpop.f32.mrb[45].mxu1  ;;  %5754 = vrot.lane.b32.xlu0 %v4290_v6, %s7430_s14 }
 0x4f8   : > { %v4518_v49 = vpop.f32.mrb[54].mxu0 }
 0x4f9   : > { %5760 = vrot.lane.b32.xlu1 %v4518_v49, %s7430_s14  ;;  %v7028_v32 = vpop.f32.mrb[55].mxu0 }
 0x4fc   : > { %v4442_v40 = vpop.f32.mrb[46].mxu1 }
 0x4fd   : > { %v4670_v12 = vpop.f32.mrb[56].mxu0  ;;  %v7023_v59 = vpop.f32.mrb[47].mxu1  ;;  %5758 = vrot.lane.b32.xlu0 %v4442_v40, %s7430_s14  ;;  %s243_s14 = sand.u32 1, %s7413_s22  }
 0x4fe   : > { %5780 = vrot.lane.b32.xlu1 %v4670_v12, %s7431_s19  ;;  %v7038_v52 = vpop.f32.mrb[57].mxu0  ;;  %s6495_s15 = sshll.u32 %s243_s14, 3  ;;  %s6419_s25 = scalar_lea.sflag [#allocation3], %s243_s14 }
 0x4ff   : > { %s245_s17 = scalar_lea.vmem [#allocation2], %s6495_s15 }
 0x500   : > { %v4594_v54 = vpop.f32.mrb[48].mxu1  ;;  %s6432_s18 = sshll.u32 %s245_s17, 4  ;;  %s8827_s18 = int_to_ptr.vmem [resolvable:$true] %s6432_s18 }
 0x501   : > { %v4822_v37 = vpop.f32.mrb[58].mxu0  ;;  %v7033_v50 = vpop.f32.mrb[49].mxu1  ;;  %5778 = vrot.lane.b32.xlu0 %v4594_v54, %s7431_s19  ;;  %s7359_s28 = scalar_lea.vmem %s8827_s18, 128 }
 0x502   : > { %5784 = vrot.lane.b32.xlu1 %v4822_v37, %s7431_s19  ;;  %v7048_v8 = vpop.f32.mrb[59].mxu0  ;;  %p7360_p11 = scmp.ne.s32.totalorder %s8827_s18, %s7359_s28 }
 0x504   : > { %v4746_v41 = vpop.f32.mrb[50].mxu1  ;;  %p7361_p12 = pnand %p7360_p11, %p7508_p5 }
 0x505   : > { %v4974_v33 = vpop.f32.mrb[60].mxu0  ;;  %v7043_v1 = vpop.f32.mrb[51].mxu1  ;;  %5782 = vrot.lane.b32.xlu0 %v4746_v41, %s7431_s19 }
 0x506   : > { %5788 = vrot.lane.b32.xlu1 %v4974_v33, %s7431_s19  ;;  %v7058_v42 = vpop.f32.mrb[61].mxu0  ;;  %p7362_p13 = pneg %p7361_p12 }
 0x508   : > { %v4898_v35 = vpop.f32.mrb[52].mxu1 }
 0x509   : > { %v5126_v9 = vpop.f32.mrb[62].mxu0  ;;  %v7053_v11 = vpop.f32.mrb[53].mxu1  ;;  %5786 = vrot.lane.b32.xlu0 %v4898_v35, %s7431_s19 }
 0x50a   : > { %5792 = vrot.lane.b32.xlu1 %v5126_v9, %s7431_s19  ;;  %v7068_v2 = vpop.f32.mrb[63].mxu0 }
 0x50d   : > { %v5050_v22 = vpop.f32.mrb[54].mxu1 }
 0x50e   : > { %v5278_v38 = vpop.f32.mrb[64].mxu0  ;;  %v7063_v24 = vpop.f32.mrb[55].mxu1  ;;  %5790 = vrot.lane.b32.xlu0 %v5050_v22, %s7431_s19 }
 0x50f   : > { %5812 = vrot.lane.b32.xlu1 %v5278_v38, %s7432_s9  ;;  %v7078_v43 = vpop.f32.mrb[65].mxu0 }
 0x511   : > { %v5202_v26 = vpop.f32.mrb[56].mxu1 }
 0x512   : > { %v5430_v30 = vpop.f32.mrb[66].mxu0  ;;  %v7073_v14 = vpop.f32.mrb[57].mxu1  ;;  %5810 = vrot.lane.b32.xlu0 %v5202_v26, %s7432_s9 }
 0x513   : > { %5816 = vrot.lane.b32.xlu1 %v5430_v30, %s7432_s9  ;;  %v7088_v17 = vpop.f32.mrb[67].mxu0 }
 0x515   : > { %v5354_v46 = vpop.f32.mrb[58].mxu1 }
 0x516   : > { %v5582_v39 = vpop.f32.mrb[68].mxu0  ;;  %v7083_v18 = vpop.f32.mrb[59].mxu1  ;;  %5814 = vrot.lane.b32.xlu0 %v5354_v46, %s7432_s9 }
 0x517   : > { %5820 = vrot.lane.b32.xlu1 %v5582_v39, %s7432_s9  ;;  %v7098_v4 = vpop.f32.mrb[69].mxu0 }
 0x519   : > { %v5506_v51 = vpop.f32.mrb[60].mxu1 }
 0x51a   : > { %5818 = vrot.lane.b32.xlu0 %v5506_v51, %s7432_s9  ;;  %v7093_v31 = vpop.f32.mrb[61].mxu1  ;;  %v5734_v20 = vpop.f32.mrb[70].mxu0 }
 0x51b   : > { %5824 = vrot.lane.b32.xlu1 %v5734_v20, %s7432_s9  ;;  %v7108_v7 = vpop.f32.mrb[71].mxu0 }
 0x51c   : > { %v6612_v7 = vld [vmem:[%s8876_s5] ss:$0 sm:$0xff] }
 0x521   : > { %v5658_v23 = vpop.f32.mrb[62].mxu1 }
 0x522   : > { %5822 = vrot.lane.b32.xlu0 %v5658_v23, %s7432_s9  ;;  %v7103_v15 = vpop.f32.mrb[63].mxu1  ;;  %s7363_s9 = sshll.u32 %s7434_s29, 4  ;;  %s7364_s9 = int_to_ptr.vmem [resolvable:$false] %s7363_s9 }
 0x523   : > { %s7365_s10 = scalar_lea.vmem %s7364_s9, 256  ;;  %p7366_p0 = scmp.lt.s32.totalorder %s8827_s18, %s7364_s9 }
 0x524   : > { %p7367_p1 = scmp.lt.s32.totalorder %s7365_s10, %s7359_s28 }
 0x526   : > { %p7368_p2 = por %p7367_p1, %p7366_p0 }
 0x528   : > { %p7369_p3 = pnand %p7368_p2, %p7362_p13 }
 0x534   : > { %v5749_v55 = vpop.permute.xlu1 %5748 }
 0x535   : > { %v5835_v59 = vsel %vm523_vm2, %v8607_v63, %v5749_v55 }
 0x53b   : > { %v5747_v16 = vpop.permute.xlu0 %5746 }
 0x53c   : > { %v5834_v12 = vsel %vm523_vm2, %v8605_v61, %v5747_v16 }
 0x53f   : > { %v5753_v45 = vpop.permute.xlu1 %5752 }
 0x540   : > { %v5837_v63 = vsel %vm523_vm2, %v8609_v34, %v5753_v45 }
 0x54f   : > { %v5751_v25 = vpop.permute.xlu0 %5750 }
 0x550   : > { %v5836_v61 = vsel %vm523_vm2, %v8611_v5, %v5751_v25 }
 0x55b   : > { %v5757_v27 = vpop.permute.xlu1 %5756 }
 0x55c   : > { %v5839_v34 = vsel %vm523_vm2, %v8613_v53, %v5757_v27 }
 0x55f   : > { %v5755_v62 = vpop.permute.xlu0 %5754 }
 0x560   : > { %v5838_v5 = vsel %vm523_vm2, %v8615_v47, %v5755_v62 }
 0x56b   : > { %v5761_v10 = vpop.permute.xlu1 %5760 }
 0x56c   : > { %v5841_v11 = vsel %vm523_vm2, %v8617_v0, %v5761_v10  ;;  %v6603_v0 = vld [vmem:[%s8875_s4] ss:$0 sm:$0xff] }
 0x56f   : > { %v5759_v57 = vpop.permute.xlu0 %5758 }
 0x570   : > { %v5781_v58 = vpop.permute.xlu1 %5780  ;;  %v5840_v53 = vsel %vm523_vm2, %v8619_v48, %v5759_v57 }
 0x571   : > { %v5844_v52 = vsel %vm5842_vm3, %v5835_v59, %v5781_v58 }
 0x573   : > { %v5779_v29 = vpop.permute.xlu0 %5778 }
 0x574   : > { %v5785_v28 = vpop.permute.xlu1 %5784  ;;  %v5843_v21 = vsel %vm5842_vm3, %v5834_v12, %v5779_v29 }
 0x575   : > { %v5846_v3 = vsel %vm5842_vm3, %v5837_v63, %v5785_v28 }
 0x577   : > { %v5783_v19 = vpop.permute.xlu0 %5782 }
 0x578   : > { %v5789_v6 = vpop.permute.xlu1 %5788  ;;  %v5845_v50 = vsel %vm5842_vm3, %v5836_v61, %v5783_v19 }
 0x579   : > { %v5848_v42 = vsel %vm5842_vm3, %v5839_v34, %v5789_v6 }
 0x57b   : > { %v5787_v44 = vpop.permute.xlu0 %5786 }
 0x57c   : > { %v5793_v49 = vpop.permute.xlu1 %5792  ;;  %v5847_v33 = vsel %vm5842_vm3, %v5838_v5, %v5787_v44 }
 0x57d   : > { %v5850_v38 = vsel %vm5842_vm3, %v5841_v11, %v5793_v49 }
 0x580   : > { %v5791_v32 = vpop.permute.xlu0 %5790 }
 0x581   : > { %v5813_v40 = vpop.permute.xlu1 %5812  ;;  %v5849_v2 = vsel %vm5842_vm3, %v5840_v53, %v5791_v32 }
 0x582   : > { %v8651_v37 = vsel %vm5851_vm4, %v5844_v52, %v5813_v40 }
 0x584   : > { %v5811_v36 = vpop.permute.xlu0 %5810 }
 0x585   : > { %v8648_v56 = vsel %vm5851_vm4, %v5843_v21, %v5811_v36  ;;  %v5817_v54 = vpop.permute.xlu1 %5816 }
 0x586   : > { %7117 = vmatprep.mubr.msk.f32.mxu1 %vm271_vm0, %v8648_v56  ;;  %v8667_v13 = vsel %vm5851_vm4, %v5846_v3, %v5817_v54 }
 0x587   : > { %7118 = vmatmul.mubr.msk.f32.vlgmr.msra.gmra.mrb[64].mxu1 %vm271_vm0, %v8651_v37 }
 0x588   : > { %v5815_v8 = vpop.permute.xlu0 %5814 }
 0x589   : > { %v8664_v60 = vsel %vm5851_vm4, %v5845_v50, %v5815_v8  ;;  %v5821_v41 = vpop.permute.xlu1 %5820  ;;  %v6055_v8 = vlaneseq }
 0x58a   : > { %7120 = vmatprep.mubr.msk.f32.mxu1 %vm271_vm0, %v8664_v60  ;;  %v8683_v9 = vsel %vm5851_vm4, %v5848_v42, %v5821_v41 }
 0x58b   : > { %7121 = vmatmul.mubr.msk.f32.gmra.mrb[66].mxu1 %vm271_vm0, %v8667_v13  ;;  %v6056_v3 = vand.u32 127, %v6055_v8  ;;  %v8719_v5 = vshrl.u32 %v6055_v8, 7 }
 0x58c   : > { %v5819_v1 = vpop.permute.xlu0 %5818 }
 0x58d   : > { %v8680_v35 = vsel %vm5851_vm4, %v5847_v33, %v5819_v1  ;;  %v5825_v47 = vpop.permute.xlu1 %5824  ;;  %v8722_v34 = vsub.s32 %v6056_v3, %v8719_v5 }
 0x58e   : > { %7123 = vmatprep.mubr.msk.f32.mxu1 %vm271_vm0, %v8680_v35  ;;  %v8699_v43 = vsel %vm5851_vm4, %v5850_v38, %v5825_v47 }
 0x58f   : > { %7124 = vmatmul.mubr.msk.f32.gmra.mrb[68].mxu1 %vm271_vm0, %v8683_v9 }
 0x594   : > { %v5823_v22 = vpop.permute.xlu0 %5822 }
 0x595   : > { %v8696_v24 = vsel %vm5851_vm4, %v5849_v2, %v5823_v22 }
 0x596   : > { %7126 = vmatprep.mubr.msk.f32.mxu1 %vm271_vm0, %v8696_v24 }
 0x597   : > { %7127 = vmatmul.mubr.msk.f32.gmra.mrb[70].mxu1 %vm271_vm0, %v8699_v43 }
 0x65a   : > { %v7119_v48 = vpop.f32.mrb[64].mxu1 }
 0x65b   : > { %v5967_v26 = vadd.f32 %v7119_v48, %v6603_v0  ;;  %v5961_v30 = vpop.f32.mrb[65].mxu1 }
 0x65c   : > { %v5962_v14 = vadd.f32 %v6603_v0, %v5961_v30 }
 0x65d   : > { %7325 = vtanh.f32 %v5967_v26 }
 0x65e   : > { %7327 = vtanh.f32 %v5962_v14  ;;  %v7122_v17 = vpop.f32.mrb[66].mxu1 }
 0x65f   : > { %v5977_v46 = vadd.f32 %v7122_v17, %v6603_v0  ;;  %v5971_v39 = vpop.f32.mrb[67].mxu1 }
 0x660   : > { %v5972_v18 = vadd.f32 %v6603_v0, %v5971_v39 }
 0x661   : > { %7329 = vtanh.f32 %v5977_v46 }
 0x662   : > { %7331 = vtanh.f32 %v5972_v18  ;;  %v7125_v4 = vpop.f32.mrb[68].mxu1 }
 0x663   : > { %v5987_v51 = vadd.f32 %v7125_v4, %v6603_v0  ;;  %v5981_v31 = vpop.f32.mrb[69].mxu1 }
 0x664   : > { %v5982_v20 = vadd.f32 %v6603_v0, %v5981_v31 }
 0x665   : > { %7333 = vtanh.f32 %v5987_v51 }
 0x666   : > { %7335 = vtanh.f32 %v5982_v20 }
 0x667   : > { %v7326_v23 = vpop.eup %7325 }
 0x668   : > { %v7328_v15 = vpop.eup %7327  ;;  %v6016_v55 = vmul.f32 %v7326_v23, %v6612_v7  ;;  %v7433_v23 = vmov 0  }
 0x669   : > { %v6015_v16 = vmul.f32 %v7328_v15, %v6612_v7  ;;  %7196 = vset.pattern.permute.xlu1 %v7433_v23  ;;  %7195 = vset.pattern.permute.xlu0 %v7433_v23  ;;  %v6110_v15 = vsub.s32 0, %v8719_v5 }
 0x66a   : > { %v7128_v45 = vpop.f32.mrb[70].mxu1  ;;  %v6026_v25 = vsel %vm5842_vm3, %v6016_v55, 0.0  ;;  %v6114_v55 = vsub.s32 1, %v8719_v5 }
 0x66b   : > { %v7330_v27 = vpop.eup %7329  ;;  %v5997_v62 = vadd.f32 %v7128_v45, %v6603_v0  ;;  %6027 = vadd.xlane.f32.xlu1 %v6026_v25  ;;  %v5991_v10 = vpop.f32.mrb[71].mxu1  ;;  %v6023_v57 = vsel %vm5842_vm3, %v6015_v16, 0.0  ;;  %v6118_v16 = vsub.s32 2, %v8719_v5  ;;  %v6122_v45 = vsub.s32 3, %v8719_v5 }
 0x66c   : > { %v7332_v58 = vpop.eup %7331  ;;  %v5992_v29 = vadd.f32 %v6603_v0, %v5991_v10  ;;  %6024 = vadd.xlane.f32.xlu0 %v6023_v57  ;;  %v6018_v28 = vmul.f32 %v7330_v27, %v6612_v7 }
 0x66d   : > { %7337 = vtanh.f32 %v5997_v62  ;;  %v6017_v44 = vmul.f32 %v7332_v58, %v6612_v7 }
 0x66e   : > { %7339 = vtanh.f32 %v5992_v29  ;;  %v6032_v19 = vsel %vm5842_vm3, %v6018_v28, 0.0  ;;  %v6126_v29 = vsub.s32 4, %v8719_v5 }
 0x66f   : > { %v7334_v6 = vpop.eup %7333  ;;  %v6029_v40 = vsel %vm5842_vm3, %v6017_v44, 0.0 }
 0x670   : > { %v7336_v49 = vpop.eup %7335  ;;  %6033 = vadd.xlane.f32.xlu0 %v6032_v19  ;;  %v6020_v59 = vmul.f32 %v7334_v6, %v6612_v7 }
 0x671   : > { %v6019_v32 = vmul.f32 %v7336_v49, %v6612_v7  ;;  %v6130_v49 = vsub.s32 5, %v8719_v5 }
 0x672   : > { %v6038_v36 = vsel %vm5842_vm3, %v6020_v59, 0.0  ;;  %v6134_v59 = vsub.s32 6, %v8719_v5 }
 0x673   : > { %v6035_v12 = vsel %vm5842_vm3, %v6019_v32, 0.0 }
 0x674   : > { %6030 = vadd.xlane.f32.xlu0 %v6029_v40  ;;  %6036 = vadd.xlane.f32.xlu1 %v6035_v12 }
 0x677   : > { %v7338_v21 = vpop.eup %7337 }
 0x678   : > { %v7340_v52 = vpop.eup %7339  ;;  %6039 = vadd.xlane.f32.xlu0 %v6038_v36  ;;  %v6022_v54 = vmul.f32 %v7338_v21, %v6612_v7 }
 0x679   : > { %v6021_v61 = vmul.f32 %v7340_v52, %v6612_v7 }
 0x67a   : > { %v6044_v63 = vsel %vm5842_vm3, %v6022_v54, 0.0  ;;  %v6138_v54 = vsub.s32 7, %v8719_v5 }
 0x67b   : > { %v6041_v50 = vsel %vm5842_vm3, %v6021_v61, 0.0 }
 0x67c   : > { %6045 = vadd.xlane.f32.xlu0 %v6044_v63  ;;  %6042 = vadd.xlane.f32.xlu1 %v6041_v50 }
 0x6f8   : > { %v6028_v33 = vpop.xlane.xlu1 %6027 }
 0x6f9   : > { %v6025_v41 = vpop.xlane.xlu0 %6024  ;;  %v6064_v42 = vrot.slane %v6028_v33, %v8722_v34 }
 0x6fa   : > { %v6060_v53 = vrot.slane %v6025_v41, %v8722_v34 }
 0x6fc   : > { %v6090_v2 = vsel %vm6089_vm5, %v6064_v42, %v6060_v53 }
 0x6fd   : > { %v6034_v1 = vpop.xlane.xlu0 %6033 }
 0x6fe   : > { %v6072_v22 = vrot.slane %v6034_v1, %v8722_v34 }
 0x701   : > { %v6031_v47 = vpop.xlane.xlu0 %6030  ;;  %v6037_v38 = vpop.xlane.xlu1 %6036 }
 0x702   : > { %v6068_v11 = vrot.slane %v6031_v47, %v8722_v34  ;;  %v6076_v30 = vrot.slane %v6037_v38, %v8722_v34 }
 0x704   : > { %v6092_v0 = vsel %vm6091_vm6, %v6068_v11, %v6090_v2 }
 0x705   : > { %v6094_v48 = vsel %vm6093_vm7, %v6072_v22, %v6092_v0  ;;  %v6040_v26 = vpop.xlane.xlu0 %6039 }
 0x706   : > { %v6080_v14 = vrot.slane %v6040_v26, %v8722_v34  ;;  %v6096_v17 = vsel %vm6095_vm8, %v6076_v30, %v6094_v48 }
 0x708   : > { %v6098_v51 = vsel %vm6097_vm9, %v6080_v14, %v6096_v17 }
 0x709   : > { %v6046_v46 = vpop.xlane.xlu0 %6045  ;;  %v6043_v39 = vpop.xlane.xlu1 %6042 }
 0x70a   : > { %v6088_v18 = vrot.slane %v6046_v46, %v8722_v34  ;;  %v6084_v4 = vrot.slane %v6043_v39, %v8722_v34 }
 0x70c   : > { %v6100_v31 = vsel %vm6099_vm10, %v6084_v4, %v6098_v51 }
 0x70d   : > { %v6102_v20 = vsel %vm6101_vm11, %v6088_v18, %v6100_v31 }
 0x70e   : > { %v6104_v7 = vsel %vm523_vm2, %v6102_v20, -inf }
 0x70f   : > { %6105 = vmax.xlane.f32.xlu1 %v6104_v7 }
 0x79c   : > { %v6106_v25 = vpop.xlane.xlu1 %6105 }
 0x79d   : > { %v6111_v27 = vrot.slane %v6106_v25, %v6110_v15  ;;  %v6115_v62 = vrot.slane %v6106_v25, %v6114_v55  ;;  %v6119_v10 = vrot.slane %v6106_v25, %v6118_v16  ;;  %v6123_v28 = vrot.slane %v6106_v25, %v6122_v45 }
 0x79e   : > { %v6127_v32 = vrot.slane %v6106_v25, %v6126_v29  ;;  %v6131_v21 = vrot.slane %v6106_v25, %v6130_v49  ;;  %v6135_v61 = vrot.slane %v6106_v25, %v6134_v59 }
 0x79f   : > { %v6148_v57 = vsub.f32 %v6025_v41, %v6111_v27  ;;  %v6149_v58 = vsub.f32 %v6028_v33, %v6115_v62  ;;  %v6150_v19 = vsub.f32 %v6031_v47, %v6119_v10  ;;  %v6151_v40 = vsub.f32 %v6034_v1, %v6123_v28 }
 0x7a0   : > { %v6152_v36 = vsub.f32 %v6037_v38, %v6127_v32  ;;  %v6153_v63 = vsub.f32 %v6040_v26, %v6131_v21  ;;  %v6139_v41 = vrot.slane %v6106_v25, %v6138_v54  ;;  %v6154_v33 = vsub.f32 %v6043_v39, %v6135_v61 }
 0x7a1   : > { %v6156_v6 = vmul.f32 1.442695, %v6148_v57  ;;  %v6158_v44 = vmul.f32 1.442695, %v6149_v58  ;;  %v6160_v12 = vmul.f32 1.442695, %v6150_v19 }
 0x7a2   : > { %v6162_v52 = vmul.f32 1.442695, %v6151_v40  ;;  %v6164_v50 = vmul.f32 1.442695, %v6152_v36  ;;  %v6166_v1 = vmul.f32 1.442695, %v6153_v63  ;;  %v6155_v53 = vsub.f32 %v6046_v46, %v6139_v41 }
 0x7a3   : > { %7341 = vpow2.f32 %v6156_v6  ;;  %v6168_v47 = vmul.f32 1.442695, %v6154_v33 }
 0x7a4   : > { %7343 = vpow2.f32 %v6158_v44  ;;  %v6170_v2 = vmul.f32 1.442695, %v6155_v53 }
 0x7a5   : > { %7345 = vpow2.f32 %v6160_v12 }
 0x7a6   : > { %7347 = vpow2.f32 %v6162_v52 }
 0x7a7   : > { %7349 = vpow2.f32 %v6164_v50 }
 0x7a8   : > { %7351 = vpow2.f32 %v6166_v1 }
 0x7a9   : > { %7353 = vpow2.f32 %v6168_v47 }
 0x7aa   : > { %7355 = vpow2.f32 %v6170_v2 }
 0x7ad   : > { %v7342_v8 = vpop.eup %7341 }
 0x7ae   : > { %v7344_v3 = vpop.eup %7343  ;;  %6181 = vperm.xlu0 %7195, %v7342_v8  }
 0x7af   : > { %6184 = vperm.xlu1 %7196, %v7344_v3   ;;  %v7346_v42 = vpop.eup %7345 }
 0x7b0   : > { %v7348_v11 = vpop.eup %7347 }
 0x7b1   : > { %v7350_v22 = vpop.eup %7349 }
 0x7b2   : > { %v7352_v38 = vpop.eup %7351 }
 0x7b3   : > { %6187 = vperm.xlu1 %7196, %v7346_v42   ;;  %v7354_v0 = vpop.eup %7353 }
 0x7b4   : > { %v7356_v48 = vpop.eup %7355 }
 0x7b7   : > { %6190 = vperm.xlu1 %7196, %v7348_v11  }
 0x7bb   : > { %6193 = vperm.xlu1 %7196, %v7350_v22  }
 0x7bf   : > { %6196 = vperm.xlu1 %7196, %v7352_v38  }
 0x7c3   : > { %6199 = vperm.xlu1 %7196, %v7354_v0  }
 0x7c7   : > { %6202 = vperm.xlu1 %7196, %v7356_v48  }
 0x82d   : > { %v6182_v46 = vpop.permute.xlu0 %6181 }
 0x82e   : > { %v6185_v26 = vpop.permute.xlu1 %6184  ;;  %v6207_v4 = vrot.slane %v6182_v46, %v8722_v34 }
 0x82f   : > { %v6211_v18 = vrot.slane %v6185_v26, %v8722_v34 }
 0x831   : > { %v6236_v23 = vsel %vm6089_vm5, %v6211_v18, %v6207_v4 }
 0x832   : > { %v6188_v30 = vpop.permute.xlu1 %6187 }
 0x833   : > { %v6215_v51 = vrot.slane %v6188_v30, %v8722_v34 }
 0x835   : > { %v6237_v27 = vsel %vm6091_vm6, %v6215_v51, %v6236_v23 }
 0x836   : > { %v6191_v14 = vpop.permute.xlu1 %6190 }
 0x837   : > { %v6219_v31 = vrot.slane %v6191_v14, %v8722_v34 }
 0x839   : > { %v6238_v10 = vsel %vm6093_vm7, %v6219_v31, %v6237_v27 }
 0x83a   : > { %v6194_v17 = vpop.permute.xlu1 %6193 }
 0x83b   : > { %v6223_v20 = vrot.slane %v6194_v17, %v8722_v34 }
 0x83d   : > { %v6239_v57 = vsel %vm6095_vm8, %v6223_v20, %v6238_v10 }
 0x83e   : > { %v6197_v39 = vpop.permute.xlu1 %6196 }
 0x83f   : > { %v6227_v25 = vrot.slane %v6197_v39, %v8722_v34 }
 0x841   : > { %v6240_v28 = vsel %vm6097_vm9, %v6227_v25, %v6239_v57 }
 0x842   : > { %v6200_v7 = vpop.permute.xlu1 %6199 }
 0x843   : > { %v6231_v62 = vrot.slane %v6200_v7, %v8722_v34 }
 0x845   : > { %v6241_v6 = vsel %vm6099_vm10, %v6231_v62, %v6240_v28 }
 0x846   : > { %v6203_v58 = vpop.permute.xlu1 %6202 }
 0x847   : > { %v6235_v19 = vrot.slane %v6203_v58, %v8722_v34 }
 0x849   : > { %v6242_v44 = vsel %vm6101_vm11, %v6235_v19, %v6241_v6 }
 0x84a   : > { %v6244_v32 = vsel %vm523_vm2, %v6242_v44, 0.0 }
 0x84b   : > { %6245 = vadd.xlane.f32.xlu1 %v6244_v32 }
 0x8d8   : > { %v6246_v40 = vpop.xlane.xlu1 %6245 }
 0x8d9   : > { %7357 = vrcp.f32 %v6246_v40 }
 0x8e3   : > { %v7358_v12 = vpop.eup %7357 }
 0x8e4   : > { %v6252_v21 = vrot.slane %v7358_v12, %v6110_v15  ;;  %v6256_v52 = vrot.slane %v7358_v12, %v6114_v55  ;;  %v6260_v34 = vrot.slane %v7358_v12, %v6118_v16  ;;  %v6264_v50 = vrot.slane %v7358_v12, %v6122_v45 }
 0x8e5   : > { %v6268_v33 = vrot.slane %v7358_v12, %v6126_v29  ;;  %v6272_v55 = vrot.slane %v7358_v12, %v6130_v49  ;;  %v6276_v16 = vrot.slane %v7358_v12, %v6134_v59  ;;  %v6280_v45 = vrot.slane %v7358_v12, %v6138_v54 }
 0x8e6   : > { %v6289_v36 = vmul.f32 %v7342_v8, %v6252_v21  ;;  %v6290_v61 = vmul.f32 %v7344_v3, %v6256_v52  ;;  %v6291_v63 = vmul.f32 %v7346_v42, %v6260_v34  ;;  %v6292_v41 = vmul.f32 %v7348_v11, %v6264_v50 }
 0x8e7   : > { %v6293_v15 = vmul.f32 %v7350_v22, %v6268_v33  ;;  %v6294_v8 = vmul.f32 %v7352_v38, %v6272_v55  ;;  %v6295_v3 = vmul.f32 %v7354_v0, %v6276_v16  ;;  %v6296_v1 = vmul.f32 %v7356_v48, %v6280_v45 }
 0x8e8   : > { %6299 = vperm.xlu0 %7195, %v6289_v36  }
 0x8ec   : > { %6304 = vperm.xlu0 %7195, %v6290_v61  }
 0x8f0   : > { %6309 = vperm.xlu0 %7195, %v6291_v63  }
 0x8f4   : > { %6314 = vperm.xlu0 %7195, %v6292_v41  }
 0x8f8   : > { %6319 = vperm.xlu0 %7195, %v6293_v15  }
 0x8fc   : > { %6324 = vperm.xlu0 %7195, %v6294_v8  }
 0x900   : > { %6329 = vperm.xlu0 %7195, %v6295_v3  }
 0x904   : > { %6334 = vperm.xlu0 %7195, %v6296_v1  }
 0x967   : > { %v6300_v42 = vpop.permute.xlu0 %6299 }
 0x968   : > { %v6337_v49 = vmul.f32 %v6300_v42, %v8648_v56 }
 0x96a   : > { %v6345_v5 = vsel %vm271_vm0, %v6337_v49, 0.0 }
 0x96b   : > { %v6305_v29 = vpop.permute.xlu0 %6304  ;;  %v6346_v26 = vrot.slane %v6345_v5, 4 }
 0x96c   : > { %v6338_v53 = vmul.f32 %v6305_v29, %v8651_v37 }
 0x96d   : > { %v6347_v46 = vadd.f32 %v6346_v26, %v6345_v5 }
 0x96e   : > { %v6352_v2 = vsel %vm271_vm0, %v6338_v53, 0.0 }
 0x96f   : > { %v6310_v47 = vpop.permute.xlu0 %6309  ;;  %v6353_v38 = vrot.slane %v6352_v2, 4  ;;  %v6348_v23 = vrot.slane %v6347_v46, 2 }
 0x970   : > { %v6339_v11 = vmul.f32 %v6310_v47, %v8664_v60 }
 0x971   : > { %v6354_v14 = vadd.f32 %v6353_v38, %v6352_v2  ;;  %v6349_v6 = vadd.f32 %v6348_v23, %v6347_v46 }
 0x972   : > { %v6359_v59 = vsel %vm271_vm0, %v6339_v11, 0.0 }
 0x973   : > { %v6315_v22 = vpop.permute.xlu0 %6314  ;;  %v6360_v0 = vrot.slane %v6359_v59, 4  ;;  %v6350_v63 = vrot.slane %v6349_v6, 1 }
 0x974   : > { %v6340_v54 = vmul.f32 %v6315_v22, %v8667_v13  ;;  %v6355_v13 = vrot.slane %v6354_v14, 2 }
 0x975   : > { %v6361_v60 = vadd.f32 %v6360_v0, %v6359_v59  ;;  %v6351_v45 = vadd.f32 %v6350_v63, %v6349_v6 }
 0x976   : > { %v6366_v48 = vsel %vm271_vm0, %v6340_v54, 0.0  ;;  %v6356_v57 = vadd.f32 %v6355_v13, %v6354_v14 }
 0x977   : > { %v6367_v37 = vrot.slane %v6366_v48, 4  ;;  %v6320_v30 = vpop.permute.xlu0 %6319  ;;  %v6362_v20 = vrot.slane %v6361_v60, 2 }
 0x978   : > { %v6341_v56 = vmul.f32 %v6320_v30, %v8680_v35  ;;  %v6357_v36 = vrot.slane %v6356_v57, 1 }
 0x979   : > { %v6368_v39 = vadd.f32 %v6367_v37, %v6366_v48  ;;  %v6363_v28 = vadd.f32 %v6362_v20, %v6361_v60 }
 0x97a   : > { %v6373_v17 = vsel %vm271_vm0, %v6341_v56, 0.0  ;;  %v6358_v55 = vadd.f32 %v6357_v36, %v6356_v57 }
 0x97b   : > { %v6374_v18 = vrot.slane %v6373_v17, 4  ;;  %v6325_v4 = vpop.permute.xlu0 %6324  ;;  %v6369_v25 = vrot.slane %v6368_v39, 2  ;;  %v6364_v34 = vrot.slane %v6363_v28, 1 }
 0x97c   : > { %v6342_v51 = vmul.f32 %v6325_v4, %v8683_v9  ;;  %v6409_v47 = vsel %vm6089_vm5, %v6358_v55, %v6351_v45 }
 0x97d   : > { %v6375_v31 = vadd.f32 %v6374_v18, %v6373_v17  ;;  %v6370_v9 = vadd.f32 %v6369_v25, %v6368_v39 }
 0x97e   : > { %v6380_v7 = vsel %vm271_vm0, %v6342_v51, 0.0 }
 0x97f   : > { %v6381_v27 = vrot.slane %v6380_v7, 4  ;;  %v6330_v62 = vpop.permute.xlu0 %6329  ;;  %v6376_v35 = vrot.slane %v6375_v31, 2  ;;  %v6371_v50 = vrot.slane %v6370_v9, 1 }
 0x980   : > { %v6343_v10 = vmul.f32 %v6330_v62, %v8696_v24 }
 0x981   : > { %v6382_v58 = vadd.f32 %v6381_v27, %v6380_v7  ;;  %v6377_v12 = vadd.f32 %v6376_v35, %v6375_v31  ;;  %v6372_v1 = vadd.f32 %v6371_v50, %v6370_v9 }
 0x982   : > { %v6387_v19 = vsel %vm271_vm0, %v6343_v10, 0.0 }
 0x983   : > { %v6383_v44 = vrot.slane %v6382_v58, 2  ;;  %v6388_v32 = vrot.slane %v6387_v19, 4  ;;  %v6335_v40 = vpop.permute.xlu0 %6334  ;;  %v6378_v15 = vrot.slane %v6377_v12, 1 }
 0x984   : > { %v6344_v21 = vmul.f32 %v6335_v40, %v8699_v43  ;;  %v6365_v43 = vadd.f32 %v6364_v34, %v6363_v28 }
 0x985   : > { %v6384_v52 = vadd.f32 %v6383_v44, %v6382_v58  ;;  %v6389_v61 = vadd.f32 %v6388_v32, %v6387_v19  ;;  %v6379_v53 = vadd.f32 %v6378_v15, %v6377_v12 }
 0x986   : > { %v6394_v24 = vsel %vm271_vm0, %v6344_v21, 0.0  ;;  %v6410_v2 = vsel %vm6091_vm6, %v6365_v43, %v6409_v47 }
 0x987   : > { %v6390_v41 = vrot.slane %v6389_v61, 2  ;;  %v6395_v33 = vrot.slane %v6394_v24, 4  ;;  %v6385_v8 = vrot.slane %v6384_v52, 1  ;;  %v6411_v22 = vsel %vm6093_vm7, %v6372_v1, %v6410_v2 }
 0x988   : > { %v6412_v54 = vsel %vm6095_vm8, %v6379_v53, %v6411_v22 }
 0x989   : > { %v6391_v16 = vadd.f32 %v6390_v41, %v6389_v61  ;;  %v6396_v3 = vadd.f32 %v6395_v33, %v6394_v24  ;;  %v6386_v49 = vadd.f32 %v6385_v8, %v6384_v52 }
 0x98b   : > { %v6392_v42 = vrot.slane %v6391_v16, 1  ;;  %v6397_v29 = vrot.slane %v6396_v3, 2  ;;  %v6413_v0 = vsel %vm6097_vm9, %v6386_v49, %v6412_v54 }
 0x98d   : > { %v6398_v11 = vadd.f32 %v6397_v29, %v6396_v3  ;;  %v6393_v59 = vadd.f32 %v6392_v42, %v6391_v16 }
 0x98f   : > { %v6399_v5 = vrot.slane %v6398_v11, 1  ;;  %v6414_v48 = vsel %vm6099_vm10, %v6393_v59, %v6413_v0 }
 0x991   : > { %v6400_v38 = vadd.f32 %v6399_v5, %v6398_v11 }
 0x993   : > { %v6415_v26 = vsel %vm6101_vm11, %v6400_v38, %v6414_v48 }
 0x994   : > { %6417 = vst.msk [vmem:[%s245_s17] sm:$0xff] %vm271_vm0, %v6415_v26 }
 0x995   : > { %7372 = shalt.err (!%p7369_p3)
}
 0x996   : > { %s7373_s11 = scalar_lea.hbm %s8825_s26, 128  ;;  %s7377_s14 = scalar_lea.hbm %s8877_s6, 256 }
 0x997   : > { %p7374_p4 = scmp.ne.s32.totalorder %s8825_s26, %s7373_s11  ;;  %p7378_p9 = scmp.lt.u32.totalorder %s8825_s26, %s8877_s6 }
 0x998   : > { %p7379_p10 = scmp.lt.u32.totalorder %s7377_s14, %s7373_s11  ;;  %p7381_p12 = scmp.lt.u32.totalorder %s7373_s11, %s8825_s26 }
 0x999   : > { %p7375_p7 = pnand %p7374_p4, %p7508_p5 }
 0x99a   : > { %p7380_p11 = por %p7379_p10, %p7378_p9 }
 0x99b   : > { %p7376_p8 = pneg %p7375_p7 }
 0x99c   : > { %p7382_p13 = por %p7381_p12, %p7380_p11 }
 0x99e   : > { %p7383_p0 = pnand %p7382_p13, %p7376_p8 }
 0x9a0   : > { %7386 = shalt.err (!%p7383_p0)
}
 0x9a1   : > { %7145 = dma.vmem_to_hbm [thread:$0]  (%p7508_p5), %s8827_s18, 128, %s8825_s26, %s6419_s25  }
 0x9a2 PF: > { %p7151_p1 = scmp.ge.s32.totalorder %s7421_s24, 2  ;;  %s6444_s17 = sand.u32 1, %s7409_s21  }
 0x9a3   : > { %s6445_s19 = scalar_lea.sflag [#allocation3], %s6444_s17 }
 0x9a4   : > { %p7148_p2 = pnand %p7151_p1, %p7512_p6 }
 0x9a6   : > { %7404 = dma.done.wait (!%p7148_p2), %s6445_s19, 128  }
 0x9a7   : > { %7406 = vsyncadd (!%p7148_p2), %s6445_s19, 4294967168  ;;  %p16_p3 = scmp.ge.s32.totalorder %s7495_s27, 4   ;;  %s8905_s21 = smov %s7413_s22 }
 0x9a8   : > { %s8906_s22 = smov %s7417_s23  ;;  %s8907_s23 = smov %s7506_s30 }
 0x9a9   : > { %s8908_s24 = smov %s7495_s27  ;;  %18 = sbr.rel (!%p16_p3) target bundleno = 3 (0x3), region = 79 }
 0x9b0   :  { %6450 = vsyncpa [#allocation3], 1 }
 0x9b1   :  { %6452 = vsyncpa [#allocation3 + $0x1], 1 }

</bundles_post_ra>
